<compile_context>
chip_gen: v7x
topology: tpu7x:2x2x1
jax: 0.10.0
libtpu: 0.0.40
codegen_flags: <defaults>
</compile_context>

<pallas_src>
import functools

import jax
import jax.numpy as jnp
from jax.experimental import pallas as pl
from jax.experimental.pallas import tpu as pltpu

LANE = 128              # TPU lane width; stacked weight dims padded to this.
MAX_BATCH_TILE = 2048   # VMEM guard for very large batches (~4-5 MB/tile).


def _round_up(n, m):
    return ((n + m - 1) // m) * m


# ---------------------------------------------------------------------------
# Kernel: whole autoencoder forward for one batch tile (6 fused matmuls).
# ---------------------------------------------------------------------------
def _ae_kernel(x_ref, w_ref, b_ref, lat_ref, rec_ref):
    in_dim = x_ref.shape[-1]       # true input_dim (x is not lane-padded)
    lat_dim = lat_ref.shape[-1]    # true latent_dim

    def layer(h_bf16, k, relu, k_rows=None):
        # bf16 x bf16 matmul on the MXU, f32 accumulation.  Padded weight
        # rows/cols and padded bias lanes are exact zeros, so padded lanes of
        # the activations stay exactly zero through every layer.
        w = w_ref[k] if k_rows is None else w_ref[k, :k_rows, :]
        acc = jnp.dot(h_bf16, w, preferred_element_type=jnp.float32)
        acc = acc + b_ref[k]                # bias add in f32 (VPU)
        if relu:
            acc = jnp.maximum(acc, 0.0)     # ReLU (Dropout = identity in eval)
        return acc

    h = x_ref[...].astype(jnp.bfloat16)     # (bt, in_dim) bf16

    # ----- encoder -----
    h = layer(h, 0, True, k_rows=in_dim).astype(jnp.bfloat16)
    h = layer(h, 1, True).astype(jnp.bfloat16)
    lat = layer(h, 2, False)                # (bt, S) f32; lanes >= lat_dim == 0
    lat_ref[...] = lat[:, :lat_dim].astype(lat_ref.dtype)

    # ----- decoder -----
    h = lat.astype(jnp.bfloat16)
    h = layer(h, 3, True).astype(jnp.bfloat16)
    h = layer(h, 4, True).astype(jnp.bfloat16)
    rec = layer(h, 5, False)
    rec_ref[...] = rec[:, :in_dim].astype(rec_ref.dtype)


# ---------------------------------------------------------------------------
# One-time parameter packing (hoisted out of the per-forward path).
# ---------------------------------------------------------------------------
def prepare_params(params):
    """Stack & zero-pad the 6 (W, b) pairs into (6, S, S) bf16 / (6, 1, S) f32."""
    S = 0
    for w, _ in params:
        S = max(S, w.shape[0], w.shape[1])
    S = _round_up(S, LANE)
    n = len(params)
    w_stack = jnp.zeros((n, S, S), jnp.float32)
    b_stack = jnp.zeros((n, 1, S), jnp.float32)
    for k, (w, b) in enumerate(params):
        fi, fo = w.shape
        w_stack = w_stack.at[k, :fi, :fo].set(w)
        b_stack = b_stack.at[k, 0, :fo].set(b)
    return w_stack.astype(jnp.bfloat16), b_stack


# ---------------------------------------------------------------------------
# Forward wrapper.
# ---------------------------------------------------------------------------
@functools.partial(jax.jit, static_argnames=("latent_dim", "batch_tile"))
def _forward(x, w_stack, b_stack, *, latent_dim, batch_tile):
    B, input_dim = x.shape
    n_layers, S, _ = w_stack.shape
    Bp = _round_up(B, batch_tile)
    x_in = x if Bp == B else jnp.pad(x, ((0, Bp - B), (0, 0)))
    grid = (Bp // batch_tile,)

    cost = pl.CostEstimate(
        flops=2 * Bp * n_layers * S * S,
        transcendentals=0,
        bytes_accessed=(x_in.size * 4 + w_stack.size * 2 + b_stack.size * 4
                        + Bp * latent_dim * 4 + Bp * input_dim * 4),
    )

    lat, rec = pl.pallas_call(
        _ae_kernel,
        out_shape=(
            jax.ShapeDtypeStruct((Bp, latent_dim), jnp.float32),
            jax.ShapeDtypeStruct((Bp, input_dim), jnp.float32),
        ),
        grid=grid,
        in_specs=[
            pl.BlockSpec((batch_tile, input_dim), lambda i: (i, 0)),
            # Constant block index: weights/biases DMA'd into VMEM once and
            # never re-fetched across grid steps.
            pl.BlockSpec(w_stack.shape, lambda i: (0, 0, 0)),
            pl.BlockSpec(b_stack.shape, lambda i: (0, 0, 0)),
        ],
        out_specs=(
            pl.BlockSpec((batch_tile, latent_dim), lambda i: (i, 0)),
            pl.BlockSpec((batch_tile, input_dim), lambda i: (i, 0)),
        ),
        compiler_params=pltpu.CompilerParams(
            dimension_semantics=("parallel",)),   # batch axis shards across TCs (v7x)
        cost_estimate=cost,
    )(x_in, w_stack, b_stack)

    if Bp != B:
        lat, rec = lat[:B], rec[:B]
    return lat, rec


def _pick_batch_tile(batch):
    """One grid step on single-TC v5e/v6e; >=2 parallel steps on dual-TC v7x."""
    try:
        kind = jax.devices()[0].device_kind.lower()
    except Exception:
        kind = ""
    n_steps = 2 if "v7" in kind else 1
    bt = max(8, _round_up(pl.cdiv(batch, n_steps), 8))
    return min(bt, MAX_BATCH_TILE)


def autoencoder_forward(x, w_stack, b_stack, latent_dim, batch_tile=None):
    """x: (B, input_dim) f32; w_stack/b_stack from prepare_params (one-time).

    Returns (latent (B, latent_dim) f32, reconstructed (B, input_dim) f32).
    """
    if batch_tile is None:
        batch_tile = _pick_batch_tile(x.shape[0])
    return _forward(x, w_stack, b_stack,
                    latent_dim=latent_dim, batch_tile=batch_tile)


# ---------------------------------------------------------------------------
# Deterministic parameter construction (mirrors the PyTorch module's shapes).
# ---------------------------------------------------------------------------
def _init_linear(key, fan_in, fan_out):
    """PyTorch-style uniform(-1/sqrt(fan_in), 1/sqrt(fan_in)); W stored as (in, out)."""
    kw, kb = jax.random.split(key)
    bound = 1.0 / jnp.sqrt(float(fan_in))
    w = jax.random.uniform(kw, (fan_in, fan_out), jnp.float32, -bound, bound)
    b = jax.random.uniform(kb, (fan_out,), jnp.float32, -bound, bound)
    return w, b


def _fold_batchnorm(w, b, gamma, beta, running_mean, running_var, eps=1e-5):
    """Fold eval-mode BatchNorm1d into the preceding Linear: y = (xW+b)*s + t."""
    scale = gamma / jnp.sqrt(running_var + eps)
    shift = beta - running_mean * scale
    return w * scale[None, :], b * scale + shift


def build_params(input_dim, latent_dim, key):
    dims = [
        (input_dim, latent_dim * 4, True),        # enc L1 (+BN)
        (latent_dim * 4, latent_dim * 2, True),   # enc L2 (+BN)
        (latent_dim * 2, latent_dim, False),      # enc L3 -> latent
        (latent_dim, latent_dim * 2, True),       # dec L1 (+BN)
        (latent_dim * 2, latent_dim * 4, True),   # dec L2 (+BN)
        (latent_dim * 4, input_dim, False),       # dec L3 -> reconstruction
    ]
    params = []
    keys = jax.random.split(key, len(dims))
    for k, (fi, fo, has_bn) in zip(keys, dims):
        w, b = _init_linear(k, fi, fo)
        if has_bn:
            gamma = jnp.ones((fo,), jnp.float32)
            beta = jnp.zeros((fo,), jnp.float32)
            rmean = jnp.zeros((fo,), jnp.float32)
            rvar = jnp.ones((fo,), jnp.float32)
            w, b = _fold_batchnorm(w, b, gamma, beta, rmean, rvar)
        params.append((w, b))
    return params


def reference_forward(x, params):
    """Pure-JAX reference matching the kernel's bf16-in / f32-accumulate math."""
    h = x.astype(jnp.bfloat16)
    acts = []
    for idx, (w, b) in enumerate(params):
        acc = jnp.dot(h, w.astype(jnp.bfloat16),
                      preferred_element_type=jnp.float32) + b
        if idx not in (2, 5):            # ReLU on all but the two final Linears
            acc = jnp.maximum(acc, 0.0)
        acts.append(acc)
        h = acc.astype(jnp.bfloat16)
    return acts[2], acts[5]


if __name__ == "__main__":
    input_dim = 32
    latent_dim = 8
    batch = 512

    key = jax.random.PRNGKey(0)
    kx, kp = jax.random.split(key)
    x = jax.random.normal(kx, (batch, input_dim), jnp.float32)
    params = build_params(input_dim, latent_dim, kp)

    # One-time parameter packing, hoisted out of the per-forward path.
    w_stack, b_stack = prepare_params(params)
    jax.block_until_ready((w_stack, b_stack))

    latent, reconstructed = autoencoder_forward(x, w_stack, b_stack, latent_dim)
    jax.block_until_ready((latent, reconstructed))

    lat_ref, rec_ref = reference_forward(x, params)
    assert latent.shape == (batch, latent_dim)
    assert reconstructed.shape == (batch, input_dim)
    assert jnp.allclose(latent, lat_ref, atol=2e-3, rtol=2e-3)
    assert jnp.allclose(reconstructed, rec_ref, atol=2e-3, rtol=2e-3)

    print("KERNEL_OK")
</pallas_src>

<mosaic_0001>
module attributes {stable_mosaic.version = 11 : i64} {
  func.func @_ae_kernel(%arg0: i32, %arg1: memref<512x32xf32, #tpu.memory_space<vmem>>, %arg2: memref<6x128x128xbf16, #tpu.memory_space<vmem>>, %arg3: memref<6x1x128xf32, #tpu.memory_space<vmem>>, %arg4: memref<512x8xf32, #tpu.memory_space<vmem>>, %arg5: memref<512x32xf32, #tpu.memory_space<vmem>>) attributes {dimension_semantics = [#tpu.dimension_semantics<parallel>], iteration_bounds = array<i64: 1>, scalar_prefetch = 0 : i64, scratch_operands = 0 : i64, tpu.core_type = #tpu.core_type<tc>, window_params = [{transform_indices = @transform_0, window_bounds = array<i64: 512, 32>}, {pipeline_mode = #tpu.pipeline_mode<synchronous>, transform_indices = @transform_1, window_bounds = array<i64: 6, 128, 128>}, {pipeline_mode = #tpu.pipeline_mode<synchronous>, transform_indices = @transform_2, window_bounds = array<i64: 6, 1, 128>}, {transform_indices = @transform_3, window_bounds = array<i64: 512, 8>}, {transform_indices = @transform_4, window_bounds = array<i64: 512, 32>}]} {
    %c0 = arith.constant 0 : index
    %c0_0 = arith.constant 0 : index
    %0 = vector.load %arg1[%c0, %c0_0] : memref<512x32xf32, #tpu.memory_space<vmem>>, vector<512x32xf32>
    %1 = arith.truncf %0 : vector<512x32xf32> to vector<512x32xbf16>
    %c0_1 = arith.constant 0 : index
    %c0_2 = arith.constant 0 : index
    %c0_3 = arith.constant 0 : index
    %2 = vector.load %arg2[%c0_1, %c0_2, %c0_3] : memref<6x128x128xbf16, #tpu.memory_space<vmem>>, vector<1x32x128xbf16>
    %3 = vector.shape_cast %2 : vector<1x32x128xbf16> to vector<32x128xbf16>
    %cst = arith.constant dense<0.000000e+00> : vector<512x128xf32>
    %4 = tpu.matmul %1, %3, %cst {dimension_numbers = #tpu.dot_dimension_numbers<[1], [0], [0], [1], [0, 0, 1, 1], [], []>} : vector<512x32xbf16>, vector<32x128xbf16>, vector<512x128xf32> -> vector<512x128xf32>
    %c0_4 = arith.constant 0 : index
    %c0_5 = arith.constant 0 : index
    %c0_6 = arith.constant 0 : index
    %5 = vector.load %arg3[%c0_4, %c0_5, %c0_6] : memref<6x1x128xf32, #tpu.memory_space<vmem>>, vector<1x1x128xf32>
    %6 = vector.shape_cast %5 : vector<1x1x128xf32> to vector<1x128xf32>
    %7 = vector.broadcast %6 : vector<1x128xf32> to vector<512x128xf32>
    %8 = arith.addf %4, %7 : vector<512x128xf32>
    %cst_7 = arith.constant 0.000000e+00 : f32
    %9 = vector.broadcast %cst_7 : f32 to vector<512x128xf32>
    %10 = arith.maximumf %8, %9 : vector<512x128xf32>
    %11 = arith.truncf %10 : vector<512x128xf32> to vector<512x128xbf16>
    %c1 = arith.constant 1 : index
    %c0_8 = arith.constant 0 : index
    %c0_9 = arith.constant 0 : index
    %12 = vector.load %arg2[%c1, %c0_8, %c0_9] : memref<6x128x128xbf16, #tpu.memory_space<vmem>>, vector<1x128x128xbf16>
    %13 = vector.shape_cast %12 : vector<1x128x128xbf16> to vector<128x128xbf16>
    %cst_10 = arith.constant dense<0.000000e+00> : vector<512x128xf32>
    %14 = tpu.matmul %11, %13, %cst_10 {dimension_numbers = #tpu.dot_dimension_numbers<[1], [0], [0], [1], [0, 0, 1, 1], [], []>} : vector<512x128xbf16>, vector<128x128xbf16>, vector<512x128xf32> -> vector<512x128xf32>
    %c1_11 = arith.constant 1 : index
    %c0_12 = arith.constant 0 : index
    %c0_13 = arith.constant 0 : index
    %15 = vector.load %arg3[%c1_11, %c0_12, %c0_13] : memref<6x1x128xf32, #tpu.memory_space<vmem>>, vector<1x1x128xf32>
    %16 = vector.shape_cast %15 : vector<1x1x128xf32> to vector<1x128xf32>
    %17 = vector.broadcast %16 : vector<1x128xf32> to vector<512x128xf32>
    %18 = arith.addf %14, %17 : vector<512x128xf32>
    %cst_14 = arith.constant 0.000000e+00 : f32
    %19 = vector.broadcast %cst_14 : f32 to vector<512x128xf32>
    %20 = arith.maximumf %18, %19 : vector<512x128xf32>
    %21 = arith.truncf %20 : vector<512x128xf32> to vector<512x128xbf16>
    %c2 = arith.constant 2 : index
    %c0_15 = arith.constant 0 : index
    %c0_16 = arith.constant 0 : index
    %22 = vector.load %arg2[%c2, %c0_15, %c0_16] : memref<6x128x128xbf16, #tpu.memory_space<vmem>>, vector<1x128x128xbf16>
    %23 = vector.shape_cast %22 : vector<1x128x128xbf16> to vector<128x128xbf16>
    %cst_17 = arith.constant dense<0.000000e+00> : vector<512x128xf32>
    %24 = tpu.matmul %21, %23, %cst_17 {dimension_numbers = #tpu.dot_dimension_numbers<[1], [0], [0], [1], [0, 0, 1, 1], [], []>} : vector<512x128xbf16>, vector<128x128xbf16>, vector<512x128xf32> -> vector<512x128xf32>
    %c2_18 = arith.constant 2 : index
    %c0_19 = arith.constant 0 : index
    %c0_20 = arith.constant 0 : index
    %25 = vector.load %arg3[%c2_18, %c0_19, %c0_20] : memref<6x1x128xf32, #tpu.memory_space<vmem>>, vector<1x1x128xf32>
    %26 = vector.shape_cast %25 : vector<1x1x128xf32> to vector<1x128xf32>
    %27 = vector.broadcast %26 : vector<1x128xf32> to vector<512x128xf32>
    %28 = arith.addf %24, %27 : vector<512x128xf32>
    %29 = vector.extract_strided_slice %28 {offsets = [0, 0], sizes = [512, 8], strides = [1, 1]} : vector<512x128xf32> to vector<512x8xf32>
    %c0_21 = arith.constant 0 : index
    %c0_22 = arith.constant 0 : index
    %30 = vector.load %arg4[%c0_21, %c0_22] : memref<512x8xf32, #tpu.memory_space<vmem>>, vector<512x8xf32>
    tpu.vector_store %arg4[%c0_21, %c0_22], %29 {strides = array<i32>} : memref<512x8xf32, #tpu.memory_space<vmem>>, vector<512x8xf32>,
    %31 = arith.truncf %28 : vector<512x128xf32> to vector<512x128xbf16>
    %c3 = arith.constant 3 : index
    %c0_23 = arith.constant 0 : index
    %c0_24 = arith.constant 0 : index
    %32 = vector.load %arg2[%c3, %c0_23, %c0_24] : memref<6x128x128xbf16, #tpu.memory_space<vmem>>, vector<1x128x128xbf16>
    %33 = vector.shape_cast %32 : vector<1x128x128xbf16> to vector<128x128xbf16>
    %cst_25 = arith.constant dense<0.000000e+00> : vector<512x128xf32>
    %34 = tpu.matmul %31, %33, %cst_25 {dimension_numbers = #tpu.dot_dimension_numbers<[1], [0], [0], [1], [0, 0, 1, 1], [], []>} : vector<512x128xbf16>, vector<128x128xbf16>, vector<512x128xf32> -> vector<512x128xf32>
    %c3_26 = arith.constant 3 : index
    %c0_27 = arith.constant 0 : index
    %c0_28 = arith.constant 0 : index
    %35 = vector.load %arg3[%c3_26, %c0_27, %c0_28] : memref<6x1x128xf32, #tpu.memory_space<vmem>>, vector<1x1x128xf32>
    %36 = vector.shape_cast %35 : vector<1x1x128xf32> to vector<1x128xf32>
    %37 = vector.broadcast %36 : vector<1x128xf32> to vector<512x128xf32>
    %38 = arith.addf %34, %37 : vector<512x128xf32>
    %cst_29 = arith.constant 0.000000e+00 : f32
    %39 = vector.broadcast %cst_29 : f32 to vector<512x128xf32>
    %40 = arith.maximumf %38, %39 : vector<512x128xf32>
    %41 = arith.truncf %40 : vector<512x128xf32> to vector<512x128xbf16>
    %c4 = arith.constant 4 : index
    %c0_30 = arith.constant 0 : index
    %c0_31 = arith.constant 0 : index
    %42 = vector.load %arg2[%c4, %c0_30, %c0_31] : memref<6x128x128xbf16, #tpu.memory_space<vmem>>, vector<1x128x128xbf16>
    %43 = vector.shape_cast %42 : vector<1x128x128xbf16> to vector<128x128xbf16>
    %cst_32 = arith.constant dense<0.000000e+00> : vector<512x128xf32>
    %44 = tpu.matmul %41, %43, %cst_32 {dimension_numbers = #tpu.dot_dimension_numbers<[1], [0], [0], [1], [0, 0, 1, 1], [], []>} : vector<512x128xbf16>, vector<128x128xbf16>, vector<512x128xf32> -> vector<512x128xf32>
    %c4_33 = arith.constant 4 : index
    %c0_34 = arith.constant 0 : index
    %c0_35 = arith.constant 0 : index
    %45 = vector.load %arg3[%c4_33, %c0_34, %c0_35] : memref<6x1x128xf32, #tpu.memory_space<vmem>>, vector<1x1x128xf32>
    %46 = vector.shape_cast %45 : vector<1x1x128xf32> to vector<1x128xf32>
    %47 = vector.broadcast %46 : vector<1x128xf32> to vector<512x128xf32>
    %48 = arith.addf %44, %47 : vector<512x128xf32>
    %cst_36 = arith.constant 0.000000e+00 : f32
    %49 = vector.broadcast %cst_36 : f32 to vector<512x128xf32>
    %50 = arith.maximumf %48, %49 : vector<512x128xf32>
    %51 = arith.truncf %50 : vector<512x128xf32> to vector<512x128xbf16>
    %c5 = arith.constant 5 : index
    %c0_37 = arith.constant 0 : index
    %c0_38 = arith.constant 0 : index
    %52 = vector.load %arg2[%c5, %c0_37, %c0_38] : memref<6x128x128xbf16, #tpu.memory_space<vmem>>, vector<1x128x128xbf16>
    %53 = vector.shape_cast %52 : vector<1x128x128xbf16> to vector<128x128xbf16>
    %cst_39 = arith.constant dense<0.000000e+00> : vector<512x128xf32>
    %54 = tpu.matmul %51, %53, %cst_39 {dimension_numbers = #tpu.dot_dimension_numbers<[1], [0], [0], [1], [0, 0, 1, 1], [], []>} : vector<512x128xbf16>, vector<128x128xbf16>, vector<512x128xf32> -> vector<512x128xf32>
    %c5_40 = arith.constant 5 : index
    %c0_41 = arith.constant 0 : index
    %c0_42 = arith.constant 0 : index
    %55 = vector.load %arg3[%c5_40, %c0_41, %c0_42] : memref<6x1x128xf32, #tpu.memory_space<vmem>>, vector<1x1x128xf32>
    %56 = vector.shape_cast %55 : vector<1x1x128xf32> to vector<1x128xf32>
    %57 = vector.broadcast %56 : vector<1x128xf32> to vector<512x128xf32>
    %58 = arith.addf %54, %57 : vector<512x128xf32>
    %59 = vector.extract_strided_slice %58 {offsets = [0, 0], sizes = [512, 32], strides = [1, 1]} : vector<512x128xf32> to vector<512x32xf32>
    %c0_43 = arith.constant 0 : index
    %c0_44 = arith.constant 0 : index
    %60 = vector.load %arg5[%c0_43, %c0_44] : memref<512x32xf32, #tpu.memory_space<vmem>>, vector<512x32xf32>
    tpu.vector_store %arg5[%c0_43, %c0_44], %59 {strides = array<i32>} : memref<512x32xf32, #tpu.memory_space<vmem>>, vector<512x32xf32>,
    return
  }
  func.func @transform_0(%arg0: i32) -> (i32, i32) {
    %c0_i32 = arith.constant 0 : i32
    %c0_i32_0 = arith.constant 0 : i32
    return %arg0, %c0_i32 : i32, i32
  }
  func.func @transform_1(%arg0: i32) -> (i32, i32, i32) {
    %c0_i32 = arith.constant 0 : i32
    %c0_i32_0 = arith.constant 0 : i32
    %c0_i32_1 = arith.constant 0 : i32
    %c0_i32_2 = arith.constant 0 : i32
    return %c0_i32, %c0_i32_0, %c0_i32_1 : i32, i32, i32
  }
  func.func @transform_2(%arg0: i32) -> (i32, i32, i32) {
    %c0_i32 = arith.constant 0 : i32
    %c0_i32_0 = arith.constant 0 : i32
    %c0_i32_1 = arith.constant 0 : i32
    %c0_i32_2 = arith.constant 0 : i32
    return %c0_i32, %c0_i32_0, %c0_i32_1 : i32, i32, i32
  }
  func.func @transform_3(%arg0: i32) -> (i32, i32) {
    %c0_i32 = arith.constant 0 : i32
    %c0_i32_0 = arith.constant 0 : i32
    return %arg0, %c0_i32 : i32, i32
  }
  func.func @transform_4(%arg0: i32) -> (i32, i32) {
    %c0_i32 = arith.constant 0 : i32
    %c0_i32_0 = arith.constant 0 : i32
    return %arg0, %c0_i32 : i32, i32
  }
}

</mosaic_0001>

<bundles_post_ra>
// kernel: _forward.1
= control target key start
LH: loop header
LB: loop body
LE: loop exit
PB: predicated region body
PF: predicated region fallthrough
CT: control target
= control target key end

     0   :  { %vm136_vm0 = vcmask 261120   ;;  %vm1438_vm1 = vcmask 64512   ;;  %s5111_s1 = inlined_call_operand.vmem [shape: bf16[6,128,128], index: 1, kind: input, shape index: {}]   ;;  %s5112_s0 = inlined_call_operand.vmem [shape: f32[512,32], index: 0, kind: input, shape index: {}]   ;;  %s5113_s2 = inlined_call_operand.vmem [shape: f32[6,1,128], index: 2, kind: input, shape index: {}]   ;;  %s5114_s3 = inlined_call_operand.vmem [shape: f32[512,8], index: 3, kind: output, shape index: {0}]   ;;  %s5115_s4 = inlined_call_operand.vmem [shape: f32[512,32], index: 4, kind: output, shape index: {1}]  }
   0x1   :  { %v3768_v0 = vld [vmem:[%s5111_s1] sm:$0xff]   ;;  %v3769_v1 = vld [vmem:[%s5111_s1 + $0x8] sm:$0xff]   ;;  %v19_v5 = vld [vmem:[%s5112_s0 + $0x10] sm:$0xff] }
   0x2   :  { %3284 = vmatprep.subr.bf16.mxu0 %v3768_v0  ;;  %v17_v2 = vld [vmem:[%s5112_s0] sm:$0xff]  ;;  %v18_v3 = vld [vmem:[%s5112_s0 + $0x8] sm:$0xff]  ;;  %v20_v6 = vld [vmem:[%s5112_s0 + $0x18] sm:$0xff] }
   0x3   :  { %3285 = vmatpush3.bf16.msra.mxu0 %v3768_v0  ;;  %v81_v4 = vpack.c.bf16 %v18_v3, %v17_v2  ;;  %v21_v7 = vld [vmem:[%s5112_s0 + $0x20] sm:$0xff]  ;;  %v22_v8 = vld [vmem:[%s5112_s0 + $0x28] sm:$0xff]  ;;  %v82_v9 = vpack.c.bf16 %v20_v6, %v19_v5  ;;  %v23_v11 = vld [vmem:[%s5112_s0 + $0x30] sm:$0xff] }
   0x4   :  { %3286 = vmatprep.subr.bf16.mxu0 %v3769_v1  ;;  %v83_v10 = vpack.c.bf16 %v22_v8, %v21_v7  ;;  %v24_v12 = vld [vmem:[%s5112_s0 + $0x38] sm:$0xff]  ;;  %v25_v13 = vld [vmem:[%s5112_s0 + $0x40] sm:$0xff]  ;;  %v26_v14 = vld [vmem:[%s5112_s0 + $0x48] sm:$0xff] }
   0x5   :  { %3288 = vmatprep.mubr.msk.bf16.mxu0 %vm136_vm0, %v81_v4  ;;  %v84_v15 = vpack.c.bf16 %v24_v12, %v23_v11  ;;  %v85_v16 = vpack.c.bf16 %v26_v14, %v25_v13  ;;  %v27_v17 = vld [vmem:[%s5112_s0 + $0x50] sm:$0xff]  ;;  %v28_v18 = vld [vmem:[%s5112_s0 + $0x58] sm:$0xff]  ;;  %v29_v19 = vld [vmem:[%s5112_s0 + $0x60] sm:$0xff] }
   0x6   :  { %v30_v20 = vld [vmem:[%s5112_s0 + $0x68] sm:$0xff]  ;;  %v86_v21 = vpack.c.bf16 %v28_v18, %v27_v17  ;;  %v3770_v23 = vld [vmem:[%s5111_s1 + $0x40] sm:$0xff]   ;;  %v31_v24 = vld [vmem:[%s5112_s0 + $0x70] sm:$0xff] }
   0x7   :  { %3287 = vmatpush3.bf16.msra.mxu0 %v3769_v1  ;;  %v87_v22 = vpack.c.bf16 %v30_v20, %v29_v19  ;;  %v32_v25 = vld [vmem:[%s5112_s0 + $0x78] sm:$0xff]  ;;  %v3771_v26 = vld [vmem:[%s5111_s1 + $0x48] sm:$0xff]   ;;  %v33_v27 = vld [vmem:[%s5112_s0 + $0x80] sm:$0xff]  ;;  %3352 = vmatprep.subr.bf16.mxu1 %v3770_v23 }
   0x8   :  { %v34_v28 = vld [vmem:[%s5112_s0 + $0x88] sm:$0xff]  ;;  %3353 = vmatpush3.bf16.msra.mxu1 %v3770_v23  ;;  %v3772_v29 = vld [vmem:[%s5111_s1 + $0x50] sm:$0xff]   ;;  %v88_v30 = vpack.c.bf16 %v32_v25, %v31_v24  ;;  %v3773_v31 = vld [vmem:[%s5111_s1 + $0x58] sm:$0xff]  }
   0x9   :  { %3354 = vmatprep.subr.bf16.mxu1 %v3771_v26  ;;  %v89_v32 = vpack.c.bf16 %v34_v28, %v33_v27  ;;  %v35_v33 = vld [vmem:[%s5112_s0 + $0x90] sm:$0xff]  ;;  %v36_v34 = vld [vmem:[%s5112_s0 + $0x98] sm:$0xff]  ;;  %v37_v35 = vld [vmem:[%s5112_s0 + $0xa0] sm:$0xff] }
   0xa   :  { %3289 = vmatmul.mubr.msk.bf16.vlgmr.msra.gmra.mrb[0].mxu0 %vm136_vm0, %v82_v9  ;;  %v38_v36 = vld [vmem:[%s5112_s0 + $0xa8] sm:$0xff]  ;;  %v3774_v37 = vld [vmem:[%s5111_s1 + $0x60] sm:$0xff]   ;;  %v90_v38 = vpack.c.bf16 %v36_v34, %v35_v33  ;;  %v39_v41 = vld [vmem:[%s5112_s0 + $0xb0] sm:$0xff] }
   0xb   :  { %3292 = vmatprep.mubr.msk.bf16.mxu0 %vm136_vm0, %v83_v10  ;;  %v3775_v39 = vld [vmem:[%s5111_s1 + $0x68] sm:$0xff]   ;;  %v91_v40 = vpack.c.bf16 %v38_v36, %v37_v35  ;;  %v40_v42 = vld [vmem:[%s5112_s0 + $0xb8] sm:$0xff]  ;;  %v41_v43 = vld [vmem:[%s5112_s0 + $0xc0] sm:$0xff] }
   0xc   :  { %3355 = vmatpush3.bf16.msra.mxu1 %v3771_v26  ;;  %v42_v44 = vld [vmem:[%s5112_s0 + $0xc8] sm:$0xff]  ;;  %v92_v45 = vpack.c.bf16 %v40_v42, %v39_v41  ;;  %v43_v47 = vld [vmem:[%s5112_s0 + $0xd0] sm:$0xff]  ;;  %v44_v48 = vld [vmem:[%s5112_s0 + $0xd8] sm:$0xff] }
   0xd   :  { %3356 = vmatprep.subr.bf16.mxu1 %v3772_v29  ;;  %v93_v46 = vpack.c.bf16 %v42_v44, %v41_v43  ;;  %v45_v49 = vld [vmem:[%s5112_s0 + $0xe0] sm:$0xff]  ;;  %v46_v50 = vld [vmem:[%s5112_s0 + $0xe8] sm:$0xff]  ;;  %v94_v51 = vpack.c.bf16 %v44_v48, %v43_v47  ;;  %v47_v53 = vld [vmem:[%s5112_s0 + $0xf0] sm:$0xff] }
   0xe   :  { %v95_v52 = vpack.c.bf16 %v46_v50, %v45_v49  ;;  %v48_v54 = vld [vmem:[%s5112_s0 + $0xf8] sm:$0xff]  ;;  %v49_v55 = vld [vmem:[%s5112_s0 + $0x100] sm:$0xff]  ;;  %v50_v56 = vld [vmem:[%s5112_s0 + $0x108] sm:$0xff] }
   0xf   :  { %v96_v57 = vpack.c.bf16 %v48_v54, %v47_v53  ;;  %v97_v58 = vpack.c.bf16 %v50_v56, %v49_v55  ;;  %v51_v59 = vld [vmem:[%s5112_s0 + $0x110] sm:$0xff]  ;;  %v52_v60 = vld [vmem:[%s5112_s0 + $0x118] sm:$0xff]  ;;  %v53_v61 = vld [vmem:[%s5112_s0 + $0x120] sm:$0xff] }
  0x10   :  { %3357 = vmatpush3.bf16.msra.mxu1 %v3772_v29  ;;  %v54_v62 = vld [vmem:[%s5112_s0 + $0x128] sm:$0xff]  ;;  %v98_v63 = vpack.c.bf16 %v52_v60, %v51_v59  ;;  %v55_v1 = vld [vmem:[%s5112_s0 + $0x130] sm:$0xff]  ;;  %v56_v2 = vld [vmem:[%s5112_s0 + $0x138] sm:$0xff] }
  0x11   :  { %3358 = vmatprep.subr.bf16.mxu1 %v3773_v31  ;;  %v99_v0 = vpack.c.bf16 %v54_v62, %v53_v61  ;;  %v57_v3 = vld [vmem:[%s5112_s0 + $0x140] sm:$0xff]  ;;  %v58_v4 = vld [vmem:[%s5112_s0 + $0x148] sm:$0xff]  ;;  %v100_v5 = vpack.c.bf16 %v56_v2, %v55_v1  ;;  %v59_v7 = vld [vmem:[%s5112_s0 + $0x150] sm:$0xff] }
  0x12   :  { %3293 = vmatmul.mubr.msk.bf16.gmra.mrb[4].mxu0 %vm136_vm0, %v84_v15  ;;  %v101_v6 = vpack.c.bf16 %v58_v4, %v57_v3  ;;  %v60_v8 = vld [vmem:[%s5112_s0 + $0x158] sm:$0xff]  ;;  %v61_v9 = vld [vmem:[%s5112_s0 + $0x160] sm:$0xff]  ;;  %v62_v10 = vld [vmem:[%s5112_s0 + $0x168] sm:$0xff] }
  0x13   :  { %3296 = vmatprep.mubr.msk.bf16.mxu0 %vm136_vm0, %v85_v16  ;;  %v102_v11 = vpack.c.bf16 %v60_v8, %v59_v7  ;;  %v103_v12 = vpack.c.bf16 %v62_v10, %v61_v9  ;;  %v63_v13 = vld [vmem:[%s5112_s0 + $0x170] sm:$0xff]  ;;  %v64_v14 = vld [vmem:[%s5112_s0 + $0x178] sm:$0xff]  ;;  %v65_v15 = vld [vmem:[%s5112_s0 + $0x180] sm:$0xff] }
  0x14   :  { %3359 = vmatpush3.bf16.msra.mxu1 %v3773_v31  ;;  %v66_v16 = vld [vmem:[%s5112_s0 + $0x188] sm:$0xff]  ;;  %v104_v17 = vpack.c.bf16 %v64_v14, %v63_v13  ;;  %v3776_v18 = vld [vmem:[%s5111_s1 + $0x70] sm:$0xff]   ;;  %v3777_v20 = vld [vmem:[%s5111_s1 + $0x78] sm:$0xff]  }
  0x15   :  { %3360 = vmatprep.subr.bf16.mxu1 %v3774_v37  ;;  %v105_v19 = vpack.c.bf16 %v66_v16, %v65_v15  ;;  %v69_v23 = vld [vmem:[%s5112_s0 + $0x1a0] sm:$0xff]  ;;  %v70_v24 = vld [vmem:[%s5112_s0 + $0x1a8] sm:$0xff]  ;;  %v71_v27 = vld [vmem:[%s5112_s0 + $0x1b0] sm:$0xff] }
  0x16   :  { %v107_v26 = vpack.c.bf16 %v70_v24, %v69_v23  ;;  %v72_v28 = vld [vmem:[%s5112_s0 + $0x1b8] sm:$0xff]  ;;  %v73_v29 = vld [vmem:[%s5112_s0 + $0x1c0] sm:$0xff]  ;;  %v75_v33 = vld [vmem:[%s5112_s0 + $0x1d0] sm:$0xff] }
  0x17   :  { %v108_v31 = vpack.c.bf16 %v72_v28, %v71_v27  ;;  %v76_v34 = vld [vmem:[%s5112_s0 + $0x1d8] sm:$0xff]  ;;  %v77_v35 = vld [vmem:[%s5112_s0 + $0x1e0] sm:$0xff]  ;;  %v78_v36 = vld [vmem:[%s5112_s0 + $0x1e8] sm:$0xff] }
  0x18   :  { %3361 = vmatpush3.bf16.msra.mxu1 %v3774_v37  ;;  %v110_v37 = vpack.c.bf16 %v76_v34, %v75_v33  ;;  %v3778_v42 = vld [vmem:[%s5111_s1 + $0x80] sm:$0xff]   ;;  %v3779_v43 = vld [vmem:[%s5111_s1 + $0x88] sm:$0xff]   ;;  %v3781_v53 = vld [vmem:[%s5111_s1 + $0x98] sm:$0xff]  }
  0x19   :  { %3362 = vmatprep.subr.bf16.mxu1 %v3775_v39  ;;  %3432 = vmatprep.subr.bf16.mxu0 %v3778_v42  ;;  %v4098_v44 = vld [vmem:[%s5113_s2] ss:$0 sm:$0xff] }
  0x1a   :  { %3297 = vmatmul.mubr.msk.bf16.gmra.mrb[8].mxu0 %vm136_vm0, %v86_v21  ;;  %v67_v21 = vld [vmem:[%s5112_s0 + $0x190] sm:$0xff]  ;;  %v3782_v60 = vld [vmem:[%s5111_s1 + $0xa0] sm:$0xff]  }
  0x1b   :  { %3300 = vmatprep.mubr.msk.bf16.mxu0 %vm136_vm0, %v87_v22  ;;  %v68_v22 = vld [vmem:[%s5112_s0 + $0x198] sm:$0xff]  ;;  %3433 = vmatpush3.bf16.msra.mxu0 %v3778_v42 }
  0x1c   :  { %3363 = vmatpush3.bf16.msra.mxu1 %v3775_v39  ;;  %v106_v25 = vpack.c.bf16 %v68_v22, %v67_v21  ;;  %v79_v39 = vld [vmem:[%s5112_s0 + $0x1f0] sm:$0xff]  ;;  %3434 = vmatprep.subr.bf16.mxu0 %v3779_v43  ;;  %v3785_v21 = vld [vmem:[%s5111_s1 + $0xb8] sm:$0xff]  }
  0x1d   :  { %3364 = vmatprep.subr.bf16.mxu1 %v3776_v18 }
  0x1f   :  { %3435 = vmatpush3.bf16.msra.mxu0 %v3779_v43 }
  0x20   :  { %3365 = vmatpush3.bf16.msra.mxu1 %v3776_v18 }
  0x21   :  { %3366 = vmatprep.subr.bf16.mxu1 %v3777_v20 }
  0x22   :  { %3301 = vmatmul.mubr.msk.bf16.gmra.mrb[12].mxu0 %vm136_vm0, %v88_v30  ;;  %v74_v30 = vld [vmem:[%s5112_s0 + $0x1c8] sm:$0xff] }
  0x23   :  { %3304 = vmatprep.mubr.msk.bf16.mxu0 %vm136_vm0, %v89_v32  ;;  %v109_v32 = vpack.c.bf16 %v74_v30, %v73_v29 }
  0x24   :  { %3367 = vmatpush3.bf16.msra.mxu1 %v3777_v20 }
  0x2a   :  { %3305 = vmatmul.mubr.msk.bf16.gmra.mrb[16].mxu0 %vm136_vm0, %v90_v38  ;;  %v111_v38 = vpack.c.bf16 %v78_v36, %v77_v35 }
  0x2b   :  { %3308 = vmatprep.mubr.msk.bf16.mxu0 %vm136_vm0, %v91_v40  ;;  %v80_v40 = vld [vmem:[%s5112_s0 + $0x1f8] sm:$0xff] }
  0x2c   :  { %v112_v41 = vpack.c.bf16 %v80_v40, %v79_v39 }
  0x32   :  { %3309 = vmatmul.mubr.msk.bf16.gmra.mrb[20].mxu0 %vm136_vm0, %v92_v45 }
  0x33   :  { %3312 = vmatprep.mubr.msk.bf16.mxu0 %vm136_vm0, %v93_v46 }
  0x3a   :  { %3313 = vmatmul.mubr.msk.bf16.gmra.mrb[24].mxu0 %vm136_vm0, %v94_v51 }
  0x3b   :  { %3316 = vmatprep.mubr.msk.bf16.mxu0 %vm136_vm0, %v95_v52  ;;  %v3780_v52 = vld [vmem:[%s5111_s1 + $0x90] sm:$0xff]  }
  0x3c   :  { %3436 = vmatprep.subr.bf16.mxu0 %v3780_v52 }
  0x3d   :  { %3437 = vmatpush3.bf16.msra.mxu0 %v3780_v52 }
  0x3e   :  { %3438 = vmatprep.subr.bf16.mxu0 %v3781_v53 }
  0x41   :  { %3439 = vmatpush3.bf16.msra.mxu0 %v3781_v53 }
  0x42   :  { %3317 = vmatmul.mubr.msk.bf16.gmra.mrb[28].mxu0 %vm136_vm0, %v96_v57  ;;  %3440 = vmatprep.subr.bf16.mxu0 %v3782_v60 }
  0x43   :  { %3320 = vmatprep.mubr.msk.bf16.mxu0 %vm136_vm0, %v97_v58 }
  0x45   :  { %3441 = vmatpush3.bf16.msra.mxu0 %v3782_v60 }
  0x4a   :  { %3321 = vmatmul.mubr.msk.bf16.gmra.mrb[32].mxu0 %vm136_vm0, %v98_v63 }
  0x4b   :  { %3324 = vmatprep.mubr.msk.bf16.mxu0 %vm136_vm0, %v99_v0 }
  0x52   :  { %3325 = vmatmul.mubr.msk.bf16.gmra.mrb[36].mxu0 %vm136_vm0, %v100_v5  ;;  %v3783_v5 = vld [vmem:[%s5111_s1 + $0xa8] sm:$0xff]  }
  0x53   :  { %3328 = vmatprep.mubr.msk.bf16.mxu0 %vm136_vm0, %v101_v6  ;;  %3442 = vmatprep.subr.bf16.mxu0 %v3783_v5 }
  0x54   :  { %3443 = vmatpush3.bf16.msra.mxu0 %v3783_v5 }
  0x5a   :  { %3329 = vmatmul.mubr.msk.bf16.gmra.mrb[40].mxu0 %vm136_vm0, %v102_v11 }
  0x5b   :  { %3332 = vmatprep.mubr.msk.bf16.mxu0 %vm136_vm0, %v103_v12  ;;  %v3784_v12 = vld [vmem:[%s5111_s1 + $0xb0] sm:$0xff]  }
  0x5c   :  { %3444 = vmatprep.subr.bf16.mxu0 %v3784_v12 }
  0x5d   :  { %3445 = vmatpush3.bf16.msra.mxu0 %v3784_v12 }
  0x5e   :  { %3446 = vmatprep.subr.bf16.mxu0 %v3785_v21 }
  0x61   :  { %3447 = vmatpush3.bf16.msra.mxu0 %v3785_v21 }
  0x62   :  { %3333 = vmatmul.mubr.msk.bf16.gmra.mrb[44].mxu0 %vm136_vm0, %v104_v17 }
  0x63   :  { %3336 = vmatprep.mubr.msk.bf16.mxu0 %vm136_vm0, %v105_v19 }
  0x6a   :  { %3337 = vmatmul.mubr.msk.bf16.gmra.mrb[48].mxu0 %vm136_vm0, %v106_v25 }
  0x6b   :  { %3340 = vmatprep.mubr.msk.bf16.mxu0 %vm136_vm0, %v107_v26 }
  0x72   :  { %3341 = vmatmul.mubr.msk.bf16.gmra.mrb[52].mxu0 %vm136_vm0, %v108_v31 }
  0x73   :  { %3344 = vmatprep.mubr.msk.bf16.mxu0 %vm136_vm0, %v109_v32 }
  0x7a   :  { %3345 = vmatmul.mubr.msk.bf16.gmra.mrb[56].mxu0 %vm136_vm0, %v110_v37 }
  0x7b   :  { %3348 = vmatprep.mubr.msk.bf16.mxu0 %vm136_vm0, %v111_v38 }
  0x82   :  { %3349 = vmatmul.mubr.msk.bf16.gmra.mrb[60].mxu0 %vm136_vm0, %v112_v41 }
  0xdd   :  { %v3290_v45 = vpop.f32.mrb[0].mxu0 }
  0xde   :  { %v276_v46 = vadd.f32 %v3290_v45, %v4098_v44  ;;  %v267_v47 = vpop.f32.mrb[1].mxu0 }
  0xdf   :  { %v268_v48 = vadd.f32 %v4098_v44, %v267_v47  ;;  %v3291_v49 = vpop.f32.mrb[2].mxu0 }
  0xe0   :  { %v279_v50 = vadd.f32 %v3291_v49, %v4098_v44  ;;  %v270_v51 = vpop.f32.mrb[3].mxu0  ;;  %v524_v55 = vmax.f32 %v276_v46, 0.0 }
  0xe1   :  { %v271_v54 = vadd.f32 %v4098_v44, %v270_v51  ;;  %v522_v57 = vmax.f32 %v268_v48, 0.0 }
  0xe2   :  { %v525_v56 = vmax.f32 %v279_v50, 0.0 }
  0xe3   :  { %v523_v58 = vmax.f32 %v271_v54, 0.0 }
  0xe4   :  { %v587_v59 = vpack.c.bf16 %v525_v56, %v524_v55 }
  0xe5   :  { %v3294_v61 = vpop.f32.mrb[4].mxu0  ;;  %v586_v62 = vpack.c.bf16 %v523_v58, %v522_v57 }
  0xe6   :  { %v292_v63 = vadd.f32 %v3294_v61, %v4098_v44  ;;  %v283_v0 = vpop.f32.mrb[5].mxu0 }
  0xe7   :  { %v284_v1 = vadd.f32 %v4098_v44, %v283_v0  ;;  %v3295_v2 = vpop.f32.mrb[6].mxu0  ;;  %3368 = vmatprep.mubr.bf16.mxu1 %v586_v62 }
  0xe8   :  { %v295_v3 = vadd.f32 %v3295_v2, %v4098_v44  ;;  %v286_v4 = vpop.f32.mrb[7].mxu0  ;;  %3369 = vmatmul.mubr.bf16.vlgmr.msra.gmra.mrb[0].mxu1 %v587_v59  ;;  %v528_v7 = vmax.f32 %v292_v63, 0.0 }
  0xe9   :  { %v287_v6 = vadd.f32 %v4098_v44, %v286_v4  ;;  %v526_v9 = vmax.f32 %v284_v1, 0.0 }
  0xea   :  { %v529_v8 = vmax.f32 %v295_v3, 0.0 }
  0xeb   :  { %v527_v10 = vmax.f32 %v287_v6, 0.0 }
  0xec   :  { %v589_v11 = vpack.c.bf16 %v529_v8, %v528_v7 }
  0xed   :  { %v588_v13 = vpack.c.bf16 %v527_v10, %v526_v9  ;;  %v3298_v14 = vpop.f32.mrb[8].mxu0 }
  0xee   :  { %v308_v15 = vadd.f32 %v3298_v14, %v4098_v44  ;;  %v299_v16 = vpop.f32.mrb[9].mxu0 }
  0xef   :  { %v300_v17 = vadd.f32 %v4098_v44, %v299_v16  ;;  %v3299_v18 = vpop.f32.mrb[10].mxu0  ;;  %3372 = vmatprep.mubr.bf16.mxu1 %v588_v13 }
  0xf0   :  { %v311_v19 = vadd.f32 %v3299_v18, %v4098_v44  ;;  %v302_v20 = vpop.f32.mrb[11].mxu0  ;;  %3373 = vmatmul.mubr.bf16.gmra.mrb[4].mxu1 %v589_v11  ;;  %v532_v23 = vmax.f32 %v308_v15, 0.0 }
  0xf1   :  { %v303_v22 = vadd.f32 %v4098_v44, %v302_v20  ;;  %v530_v25 = vmax.f32 %v300_v17, 0.0 }
  0xf2   :  { %v533_v24 = vmax.f32 %v311_v19, 0.0 }
  0xf3   :  { %v531_v26 = vmax.f32 %v303_v22, 0.0 }
  0xf4   :  { %v591_v27 = vpack.c.bf16 %v533_v24, %v532_v23 }
  0xf5   :  { %v590_v28 = vpack.c.bf16 %v531_v26, %v530_v25  ;;  %v3302_v29 = vpop.f32.mrb[12].mxu0 }
  0xf6   :  { %v324_v30 = vadd.f32 %v3302_v29, %v4098_v44  ;;  %v315_v31 = vpop.f32.mrb[13].mxu0 }
  0xf7   :  { %v316_v32 = vadd.f32 %v4098_v44, %v315_v31  ;;  %v3303_v33 = vpop.f32.mrb[14].mxu0  ;;  %3376 = vmatprep.mubr.bf16.mxu1 %v590_v28 }
  0xf8   :  { %v327_v34 = vadd.f32 %v3303_v33, %v4098_v44  ;;  %v318_v35 = vpop.f32.mrb[15].mxu0  ;;  %3377 = vmatmul.mubr.bf16.gmra.mrb[8].mxu1 %v591_v27  ;;  %v536_v37 = vmax.f32 %v324_v30, 0.0 }
  0xf9   :  { %v319_v36 = vadd.f32 %v4098_v44, %v318_v35  ;;  %v534_v39 = vmax.f32 %v316_v32, 0.0 }
  0xfa   :  { %v537_v38 = vmax.f32 %v327_v34, 0.0 }
  0xfb   :  { %v535_v40 = vmax.f32 %v319_v36, 0.0 }
  0xfc   :  { %v593_v41 = vpack.c.bf16 %v537_v38, %v536_v37 }
  0xfd   :  { %v592_v42 = vpack.c.bf16 %v535_v40, %v534_v39  ;;  %v3306_v43 = vpop.f32.mrb[16].mxu0 }
  0xfe   :  { %v340_v45 = vadd.f32 %v3306_v43, %v4098_v44  ;;  %v331_v46 = vpop.f32.mrb[17].mxu0 }
  0xff   :  { %v332_v47 = vadd.f32 %v4098_v44, %v331_v46  ;;  %v3307_v48 = vpop.f32.mrb[18].mxu0  ;;  %3380 = vmatprep.mubr.bf16.mxu1 %v592_v42 }
 0x100   :  { %v343_v49 = vadd.f32 %v3307_v48, %v4098_v44  ;;  %v334_v50 = vpop.f32.mrb[19].mxu0  ;;  %3381 = vmatmul.mubr.bf16.gmra.mrb[12].mxu1 %v593_v41  ;;  %v540_v52 = vmax.f32 %v340_v45, 0.0 }
 0x101   :  { %v335_v51 = vadd.f32 %v4098_v44, %v334_v50  ;;  %v538_v54 = vmax.f32 %v332_v47, 0.0 }
 0x102   :  { %v541_v53 = vmax.f32 %v343_v49, 0.0 }
 0x103   :  { %v539_v55 = vmax.f32 %v335_v51, 0.0 }
 0x104   :  { %v595_v56 = vpack.c.bf16 %v541_v53, %v540_v52 }
 0x105   :  { %v594_v57 = vpack.c.bf16 %v539_v55, %v538_v54  ;;  %v3310_v58 = vpop.f32.mrb[20].mxu0 }
 0x106   :  { %v356_v59 = vadd.f32 %v3310_v58, %v4098_v44  ;;  %v347_v60 = vpop.f32.mrb[21].mxu0 }
 0x107   :  { %v348_v61 = vadd.f32 %v4098_v44, %v347_v60  ;;  %v3311_v62 = vpop.f32.mrb[22].mxu0  ;;  %3384 = vmatprep.mubr.bf16.mxu1 %v594_v57 }
 0x108   :  { %v359_v63 = vadd.f32 %v3311_v62, %v4098_v44  ;;  %v350_v0 = vpop.f32.mrb[23].mxu0  ;;  %3385 = vmatmul.mubr.bf16.gmra.mrb[16].mxu1 %v595_v56  ;;  %v544_v2 = vmax.f32 %v356_v59, 0.0 }
 0x109   :  { %v351_v1 = vadd.f32 %v4098_v44, %v350_v0  ;;  %v542_v4 = vmax.f32 %v348_v61, 0.0 }
 0x10a   :  { %v545_v3 = vmax.f32 %v359_v63, 0.0 }
 0x10b   :  { %v543_v5 = vmax.f32 %v351_v1, 0.0 }
 0x10c   :  { %v597_v6 = vpack.c.bf16 %v545_v3, %v544_v2 }
 0x10d   :  { %v596_v7 = vpack.c.bf16 %v543_v5, %v542_v4  ;;  %v3314_v8 = vpop.f32.mrb[24].mxu0 }
 0x10e   :  { %v372_v9 = vadd.f32 %v3314_v8, %v4098_v44  ;;  %v363_v10 = vpop.f32.mrb[25].mxu0 }
 0x10f   :  { %v364_v11 = vadd.f32 %v4098_v44, %v363_v10  ;;  %v3315_v12 = vpop.f32.mrb[26].mxu0  ;;  %3388 = vmatprep.mubr.bf16.mxu1 %v596_v7 }
 0x110   :  { %v375_v13 = vadd.f32 %v3315_v12, %v4098_v44  ;;  %v366_v14 = vpop.f32.mrb[27].mxu0  ;;  %3389 = vmatmul.mubr.bf16.gmra.mrb[20].mxu1 %v597_v6  ;;  %v548_v16 = vmax.f32 %v372_v9, 0.0 }
 0x111   :  { %v367_v15 = vadd.f32 %v4098_v44, %v366_v14  ;;  %v546_v18 = vmax.f32 %v364_v11, 0.0 }
 0x112   :  { %v549_v17 = vmax.f32 %v375_v13, 0.0 }
 0x113   :  { %v547_v19 = vmax.f32 %v367_v15, 0.0 }
 0x114   :  { %v599_v20 = vpack.c.bf16 %v549_v17, %v548_v16 }
 0x115   :  { %v598_v21 = vpack.c.bf16 %v547_v19, %v546_v18  ;;  %v3318_v22 = vpop.f32.mrb[28].mxu0 }
 0x116   :  { %v388_v23 = vadd.f32 %v3318_v22, %v4098_v44  ;;  %v379_v24 = vpop.f32.mrb[29].mxu0 }
 0x117   :  { %v380_v25 = vadd.f32 %v4098_v44, %v379_v24  ;;  %v3319_v26 = vpop.f32.mrb[30].mxu0  ;;  %3392 = vmatprep.mubr.bf16.mxu1 %v598_v21 }
 0x118   :  { %v391_v27 = vadd.f32 %v3319_v26, %v4098_v44  ;;  %v382_v28 = vpop.f32.mrb[31].mxu0  ;;  %3393 = vmatmul.mubr.bf16.gmra.mrb[24].mxu1 %v599_v20  ;;  %v552_v30 = vmax.f32 %v388_v23, 0.0 }
 0x119   :  { %v383_v29 = vadd.f32 %v4098_v44, %v382_v28  ;;  %v550_v32 = vmax.f32 %v380_v25, 0.0 }
 0x11a   :  { %v553_v31 = vmax.f32 %v391_v27, 0.0 }
 0x11b   :  { %v551_v33 = vmax.f32 %v383_v29, 0.0 }
 0x11c   :  { %v601_v34 = vpack.c.bf16 %v553_v31, %v552_v30 }
 0x11d   :  { %v600_v35 = vpack.c.bf16 %v551_v33, %v550_v32  ;;  %v3322_v36 = vpop.f32.mrb[32].mxu0 }
 0x11e   :  { %v404_v37 = vadd.f32 %v3322_v36, %v4098_v44  ;;  %v395_v38 = vpop.f32.mrb[33].mxu0 }
 0x11f   :  { %v396_v39 = vadd.f32 %v4098_v44, %v395_v38  ;;  %v3323_v40 = vpop.f32.mrb[34].mxu0  ;;  %3396 = vmatprep.mubr.bf16.mxu1 %v600_v35 }
 0x120   :  { %v407_v41 = vadd.f32 %v3323_v40, %v4098_v44  ;;  %v398_v42 = vpop.f32.mrb[35].mxu0  ;;  %3397 = vmatmul.mubr.bf16.gmra.mrb[28].mxu1 %v601_v34  ;;  %v556_v45 = vmax.f32 %v404_v37, 0.0 }
 0x121   :  { %v399_v43 = vadd.f32 %v4098_v44, %v398_v42  ;;  %v554_v47 = vmax.f32 %v396_v39, 0.0 }
 0x122   :  { %v557_v46 = vmax.f32 %v407_v41, 0.0 }
 0x123   :  { %v555_v48 = vmax.f32 %v399_v43, 0.0 }
 0x124   :  { %v603_v49 = vpack.c.bf16 %v557_v46, %v556_v45 }
 0x125   :  { %v602_v50 = vpack.c.bf16 %v555_v48, %v554_v47  ;;  %v3326_v51 = vpop.f32.mrb[36].mxu0 }
 0x126   :  { %v420_v52 = vadd.f32 %v3326_v51, %v4098_v44  ;;  %v411_v53 = vpop.f32.mrb[37].mxu0 }
 0x127   :  { %v412_v54 = vadd.f32 %v4098_v44, %v411_v53  ;;  %v3327_v55 = vpop.f32.mrb[38].mxu0  ;;  %3400 = vmatprep.mubr.bf16.mxu1 %v602_v50 }
 0x128   :  { %v423_v56 = vadd.f32 %v3327_v55, %v4098_v44  ;;  %v414_v57 = vpop.f32.mrb[39].mxu0  ;;  %3401 = vmatmul.mubr.bf16.gmra.mrb[32].mxu1 %v603_v49  ;;  %v560_v59 = vmax.f32 %v420_v52, 0.0 }
 0x129   :  { %v415_v58 = vadd.f32 %v4098_v44, %v414_v57  ;;  %v558_v61 = vmax.f32 %v412_v54, 0.0 }
 0x12a   :  { %v561_v60 = vmax.f32 %v423_v56, 0.0 }
 0x12b   :  { %v559_v62 = vmax.f32 %v415_v58, 0.0 }
 0x12c   :  { %v605_v63 = vpack.c.bf16 %v561_v60, %v560_v59 }
 0x12d   :  { %v604_v0 = vpack.c.bf16 %v559_v62, %v558_v61  ;;  %v3330_v1 = vpop.f32.mrb[40].mxu0 }
 0x12e   :  { %v436_v2 = vadd.f32 %v3330_v1, %v4098_v44  ;;  %v427_v3 = vpop.f32.mrb[41].mxu0 }
 0x12f   :  { %v428_v4 = vadd.f32 %v4098_v44, %v427_v3  ;;  %v3331_v5 = vpop.f32.mrb[42].mxu0  ;;  %3404 = vmatprep.mubr.bf16.mxu1 %v604_v0 }
 0x130   :  { %v439_v6 = vadd.f32 %v3331_v5, %v4098_v44  ;;  %v430_v7 = vpop.f32.mrb[43].mxu0  ;;  %3405 = vmatmul.mubr.bf16.gmra.mrb[36].mxu1 %v605_v63  ;;  %v564_v9 = vmax.f32 %v436_v2, 0.0 }
 0x131   :  { %v431_v8 = vadd.f32 %v4098_v44, %v430_v7  ;;  %v562_v11 = vmax.f32 %v428_v4, 0.0 }
 0x132   :  { %v565_v10 = vmax.f32 %v439_v6, 0.0 }
 0x133   :  { %v563_v12 = vmax.f32 %v431_v8, 0.0 }
 0x134   :  { %v607_v13 = vpack.c.bf16 %v565_v10, %v564_v9 }
 0x135   :  { %v606_v14 = vpack.c.bf16 %v563_v12, %v562_v11  ;;  %v3334_v15 = vpop.f32.mrb[44].mxu0 }
 0x136   :  { %v452_v16 = vadd.f32 %v3334_v15, %v4098_v44  ;;  %v443_v17 = vpop.f32.mrb[45].mxu0 }
 0x137   :  { %v444_v18 = vadd.f32 %v4098_v44, %v443_v17  ;;  %v3335_v19 = vpop.f32.mrb[46].mxu0  ;;  %3408 = vmatprep.mubr.bf16.mxu1 %v606_v14 }
 0x138   :  { %v455_v20 = vadd.f32 %v3335_v19, %v4098_v44  ;;  %v446_v21 = vpop.f32.mrb[47].mxu0  ;;  %3409 = vmatmul.mubr.bf16.gmra.mrb[40].mxu1 %v607_v13  ;;  %v568_v23 = vmax.f32 %v452_v16, 0.0 }
 0x139   :  { %v447_v22 = vadd.f32 %v4098_v44, %v446_v21  ;;  %v566_v25 = vmax.f32 %v444_v18, 0.0 }
 0x13a   :  { %v569_v24 = vmax.f32 %v455_v20, 0.0 }
 0x13b   :  { %v567_v26 = vmax.f32 %v447_v22, 0.0  ;;  %v3786_v22 = vld [vmem:[%s5111_s1 + $0xc0] sm:$0xff]  }
 0x13c   :  { %v609_v27 = vpack.c.bf16 %v569_v24, %v568_v23  ;;  %3512 = vmatprep.subr.bf16.mxu1 %v3786_v22  ;;  %v3787_v23 = vld [vmem:[%s5111_s1 + $0xc8] sm:$0xff]  }
 0x13d   :  { %v608_v28 = vpack.c.bf16 %v567_v26, %v566_v25  ;;  %v3338_v29 = vpop.f32.mrb[48].mxu0  ;;  %3513 = vmatpush3.bf16.msra.mxu1 %v3786_v22 }
 0x13e   :  { %v468_v30 = vadd.f32 %v3338_v29, %v4098_v44  ;;  %v459_v31 = vpop.f32.mrb[49].mxu0  ;;  %3514 = vmatprep.subr.bf16.mxu1 %v3787_v23 }
 0x13f   :  { %v460_v32 = vadd.f32 %v4098_v44, %v459_v31  ;;  %v3339_v33 = vpop.f32.mrb[50].mxu0  ;;  %3412 = vmatprep.mubr.bf16.mxu1 %v608_v28  ;;  %v3788_v31 = vld [vmem:[%s5111_s1 + $0xd0] sm:$0xff]  }
 0x140   :  { %v471_v34 = vadd.f32 %v3339_v33, %v4098_v44  ;;  %v462_v35 = vpop.f32.mrb[51].mxu0  ;;  %3413 = vmatmul.mubr.bf16.gmra.mrb[44].mxu1 %v609_v27  ;;  %v572_v37 = vmax.f32 %v468_v30, 0.0 }
 0x141   :  { %v463_v36 = vadd.f32 %v4098_v44, %v462_v35  ;;  %v570_v39 = vmax.f32 %v460_v32, 0.0  ;;  %3515 = vmatpush3.bf16.msra.mxu1 %v3787_v23  ;;  %v3789_v32 = vld [vmem:[%s5111_s1 + $0xd8] sm:$0xff]  }
 0x142   :  { %v573_v38 = vmax.f32 %v471_v34, 0.0  ;;  %3516 = vmatprep.subr.bf16.mxu1 %v3788_v31 }
 0x143   :  { %v571_v40 = vmax.f32 %v463_v36, 0.0 }
 0x144   :  { %v611_v41 = vpack.c.bf16 %v573_v38, %v572_v37 }
 0x145   :  { %v610_v42 = vpack.c.bf16 %v571_v40, %v570_v39  ;;  %v3342_v43 = vpop.f32.mrb[52].mxu0  ;;  %3517 = vmatpush3.bf16.msra.mxu1 %v3788_v31  ;;  %v3790_v39 = vld [vmem:[%s5111_s1 + $0xe0] sm:$0xff]  }
 0x146   :  { %v484_v45 = vadd.f32 %v3342_v43, %v4098_v44  ;;  %v475_v46 = vpop.f32.mrb[53].mxu0  ;;  %3518 = vmatprep.subr.bf16.mxu1 %v3789_v32 }
 0x147   :  { %v476_v47 = vadd.f32 %v4098_v44, %v475_v46  ;;  %v3343_v48 = vpop.f32.mrb[54].mxu0  ;;  %3416 = vmatprep.mubr.bf16.mxu1 %v610_v42 }
 0x148   :  { %v487_v49 = vadd.f32 %v3343_v48, %v4098_v44  ;;  %v478_v50 = vpop.f32.mrb[55].mxu0  ;;  %3417 = vmatmul.mubr.bf16.gmra.mrb[48].mxu1 %v611_v41  ;;  %v576_v52 = vmax.f32 %v484_v45, 0.0 }
 0x149   :  { %v479_v51 = vadd.f32 %v4098_v44, %v478_v50  ;;  %v574_v54 = vmax.f32 %v476_v47, 0.0  ;;  %3519 = vmatpush3.bf16.msra.mxu1 %v3789_v32 }
 0x14a   :  { %v577_v53 = vmax.f32 %v487_v49, 0.0  ;;  %3520 = vmatprep.subr.bf16.mxu1 %v3790_v39  ;;  %v3791_v49 = vld [vmem:[%s5111_s1 + $0xe8] sm:$0xff]  }
 0x14b   :  { %v575_v55 = vmax.f32 %v479_v51, 0.0 }
 0x14c   :  { %v613_v56 = vpack.c.bf16 %v577_v53, %v576_v52 }
 0x14d   :  { %v612_v57 = vpack.c.bf16 %v575_v55, %v574_v54  ;;  %v3346_v58 = vpop.f32.mrb[56].mxu0  ;;  %3521 = vmatpush3.bf16.msra.mxu1 %v3790_v39 }
 0x14e   :  { %v500_v59 = vadd.f32 %v3346_v58, %v4098_v44  ;;  %v491_v60 = vpop.f32.mrb[57].mxu0  ;;  %3522 = vmatprep.subr.bf16.mxu1 %v3791_v49 }
 0x14f   :  { %v492_v61 = vadd.f32 %v4098_v44, %v491_v60  ;;  %v3347_v62 = vpop.f32.mrb[58].mxu0  ;;  %3420 = vmatprep.mubr.bf16.mxu1 %v612_v57 }
 0x150   :  { %v503_v63 = vadd.f32 %v3347_v62, %v4098_v44  ;;  %v494_v0 = vpop.f32.mrb[59].mxu0  ;;  %3421 = vmatmul.mubr.bf16.gmra.mrb[52].mxu1 %v613_v56  ;;  %v580_v2 = vmax.f32 %v500_v59, 0.0  ;;  %v3792_v56 = vld [vmem:[%s5111_s1 + $0xf0] sm:$0xff]  }
 0x151   :  { %v495_v1 = vadd.f32 %v4098_v44, %v494_v0  ;;  %v578_v4 = vmax.f32 %v492_v61, 0.0  ;;  %3523 = vmatpush3.bf16.msra.mxu1 %v3791_v49 }
 0x152   :  { %v581_v3 = vmax.f32 %v503_v63, 0.0  ;;  %3524 = vmatprep.subr.bf16.mxu1 %v3792_v56 }
 0x153   :  { %v579_v5 = vmax.f32 %v495_v1, 0.0  ;;  %v3793_v1 = vld [vmem:[%s5111_s1 + $0xf8] sm:$0xff]  }
 0x154   :  { %v615_v6 = vpack.c.bf16 %v581_v3, %v580_v2 }
 0x155   :  { %v614_v7 = vpack.c.bf16 %v579_v5, %v578_v4  ;;  %v3350_v8 = vpop.f32.mrb[60].mxu0  ;;  %3525 = vmatpush3.bf16.msra.mxu1 %v3792_v56 }
 0x156   :  { %v516_v9 = vadd.f32 %v3350_v8, %v4098_v44  ;;  %v507_v10 = vpop.f32.mrb[61].mxu0  ;;  %3526 = vmatprep.subr.bf16.mxu1 %v3793_v1 }
 0x157   :  { %v508_v11 = vadd.f32 %v4098_v44, %v507_v10  ;;  %v3351_v12 = vpop.f32.mrb[62].mxu0  ;;  %3424 = vmatprep.mubr.bf16.mxu1 %v614_v7 }
 0x158   :  { %v519_v13 = vadd.f32 %v3351_v12, %v4098_v44  ;;  %v510_v14 = vpop.f32.mrb[63].mxu0  ;;  %3425 = vmatmul.mubr.bf16.gmra.mrb[56].mxu1 %v615_v6  ;;  %v584_v16 = vmax.f32 %v516_v9, 0.0 }
 0x159   :  { %v511_v15 = vadd.f32 %v4098_v44, %v510_v14  ;;  %v582_v18 = vmax.f32 %v508_v11, 0.0  ;;  %v4191_v44 = vld [vmem:[%s5113_s2 + $0x1] ss:$0 sm:$0xff]  ;;  %3527 = vmatpush3.bf16.msra.mxu1 %v3793_v1 }
 0x15a   :  { %v585_v17 = vmax.f32 %v519_v13, 0.0 }
 0x15b   :  { %v583_v19 = vmax.f32 %v511_v15, 0.0 }
 0x15c   :  { %v617_v20 = vpack.c.bf16 %v585_v17, %v584_v16 }
 0x15d   :  { %v616_v21 = vpack.c.bf16 %v583_v19, %v582_v18 }
 0x15f   :  { %3428 = vmatprep.mubr.bf16.mxu1 %v616_v21 }
 0x160   :  { %3429 = vmatmul.mubr.bf16.gmra.mrb[60].mxu1 %v617_v20 }
 0x1bb   :  { %v3370_v24 = vpop.f32.mrb[0].mxu1 }
 0x1bc   :  { %v734_v25 = vadd.f32 %v3370_v24, %v4191_v44  ;;  %v725_v26 = vpop.f32.mrb[1].mxu1 }
 0x1bd   :  { %v726_v27 = vadd.f32 %v4191_v44, %v725_v26  ;;  %v3371_v28 = vpop.f32.mrb[2].mxu1 }
 0x1be   :  { %v737_v29 = vadd.f32 %v3371_v28, %v4191_v44  ;;  %v728_v30 = vpop.f32.mrb[3].mxu1  ;;  %v982_v34 = vmax.f32 %v734_v25, 0.0 }
 0x1bf   :  { %v729_v33 = vadd.f32 %v4191_v44, %v728_v30  ;;  %v980_v36 = vmax.f32 %v726_v27, 0.0 }
 0x1c0   :  { %v983_v35 = vmax.f32 %v737_v29, 0.0 }
 0x1c1   :  { %v981_v37 = vmax.f32 %v729_v33, 0.0 }
 0x1c2   :  { %v1045_v38 = vpack.c.bf16 %v983_v35, %v982_v34 }
 0x1c3   :  { %v1044_v40 = vpack.c.bf16 %v981_v37, %v980_v36  ;;  %v3374_v41 = vpop.f32.mrb[4].mxu1 }
 0x1c4   :  { %v750_v42 = vadd.f32 %v3374_v41, %v4191_v44  ;;  %v741_v43 = vpop.f32.mrb[5].mxu1 }
 0x1c5   :  { %v742_v45 = vadd.f32 %v4191_v44, %v741_v43  ;;  %v3375_v46 = vpop.f32.mrb[6].mxu1  ;;  %3448 = vmatprep.mubr.bf16.mxu0 %v1044_v40 }
 0x1c6   :  { %v753_v47 = vadd.f32 %v3375_v46, %v4191_v44  ;;  %v744_v48 = vpop.f32.mrb[7].mxu1  ;;  %3449 = vmatmul.mubr.bf16.vlgmr.msra.gmra.mrb[64].mxu0 %v1045_v38  ;;  %v986_v51 = vmax.f32 %v750_v42, 0.0 }
 0x1c7   :  { %v745_v50 = vadd.f32 %v4191_v44, %v744_v48  ;;  %v984_v53 = vmax.f32 %v742_v45, 0.0 }
 0x1c8   :  { %v987_v52 = vmax.f32 %v753_v47, 0.0 }
 0x1c9   :  { %v985_v54 = vmax.f32 %v745_v50, 0.0 }
 0x1ca   :  { %v1047_v55 = vpack.c.bf16 %v987_v52, %v986_v51 }
 0x1cb   :  { %v1046_v57 = vpack.c.bf16 %v985_v54, %v984_v53  ;;  %v3378_v58 = vpop.f32.mrb[8].mxu1 }
 0x1cc   :  { %v766_v59 = vadd.f32 %v3378_v58, %v4191_v44  ;;  %v757_v60 = vpop.f32.mrb[9].mxu1 }
 0x1cd   :  { %v758_v61 = vadd.f32 %v4191_v44, %v757_v60  ;;  %v3379_v62 = vpop.f32.mrb[10].mxu1  ;;  %3452 = vmatprep.mubr.bf16.mxu0 %v1046_v57 }
 0x1ce   :  { %v769_v63 = vadd.f32 %v3379_v62, %v4191_v44  ;;  %v760_v0 = vpop.f32.mrb[11].mxu1  ;;  %3453 = vmatmul.mubr.bf16.gmra.mrb[68].mxu0 %v1047_v55  ;;  %v990_v3 = vmax.f32 %v766_v59, 0.0 }
 0x1cf   :  { %v761_v2 = vadd.f32 %v4191_v44, %v760_v0  ;;  %v988_v5 = vmax.f32 %v758_v61, 0.0 }
 0x1d0   :  { %v991_v4 = vmax.f32 %v769_v63, 0.0 }
 0x1d1   :  { %v989_v6 = vmax.f32 %v761_v2, 0.0 }
 0x1d2   :  { %v1049_v7 = vpack.c.bf16 %v991_v4, %v990_v3 }
 0x1d3   :  { %v1048_v8 = vpack.c.bf16 %v989_v6, %v988_v5  ;;  %v3382_v9 = vpop.f32.mrb[12].mxu1 }
 0x1d4   :  { %v782_v10 = vadd.f32 %v3382_v9, %v4191_v44  ;;  %v773_v11 = vpop.f32.mrb[13].mxu1 }
 0x1d5   :  { %v774_v12 = vadd.f32 %v4191_v44, %v773_v11  ;;  %v3383_v13 = vpop.f32.mrb[14].mxu1  ;;  %3456 = vmatprep.mubr.bf16.mxu0 %v1048_v8 }
 0x1d6   :  { %v785_v14 = vadd.f32 %v3383_v13, %v4191_v44  ;;  %v776_v15 = vpop.f32.mrb[15].mxu1  ;;  %3457 = vmatmul.mubr.bf16.gmra.mrb[72].mxu0 %v1049_v7  ;;  %v994_v17 = vmax.f32 %v782_v10, 0.0 }
 0x1d7   :  { %v777_v16 = vadd.f32 %v4191_v44, %v776_v15  ;;  %v992_v19 = vmax.f32 %v774_v12, 0.0 }
 0x1d8   :  { %v995_v18 = vmax.f32 %v785_v14, 0.0 }
 0x1d9   :  { %v993_v20 = vmax.f32 %v777_v16, 0.0 }
 0x1da   :  { %v1051_v21 = vpack.c.bf16 %v995_v18, %v994_v17 }
 0x1db   :  { %v1050_v22 = vpack.c.bf16 %v993_v20, %v992_v19  ;;  %v3386_v23 = vpop.f32.mrb[16].mxu1 }
 0x1dc   :  { %v798_v24 = vadd.f32 %v3386_v23, %v4191_v44  ;;  %v789_v25 = vpop.f32.mrb[17].mxu1 }
 0x1dd   :  { %v790_v26 = vadd.f32 %v4191_v44, %v789_v25  ;;  %v3387_v27 = vpop.f32.mrb[18].mxu1  ;;  %3460 = vmatprep.mubr.bf16.mxu0 %v1050_v22 }
 0x1de   :  { %v801_v28 = vadd.f32 %v3387_v27, %v4191_v44  ;;  %v792_v29 = vpop.f32.mrb[19].mxu1  ;;  %3461 = vmatmul.mubr.bf16.gmra.mrb[76].mxu0 %v1051_v21  ;;  %v998_v31 = vmax.f32 %v798_v24, 0.0 }
 0x1df   :  { %v793_v30 = vadd.f32 %v4191_v44, %v792_v29  ;;  %v996_v33 = vmax.f32 %v790_v26, 0.0 }
 0x1e0   :  { %v999_v32 = vmax.f32 %v801_v28, 0.0 }
 0x1e1   :  { %v997_v34 = vmax.f32 %v793_v30, 0.0 }
 0x1e2   :  { %v1053_v35 = vpack.c.bf16 %v999_v32, %v998_v31 }
 0x1e3   :  { %v1052_v36 = vpack.c.bf16 %v997_v34, %v996_v33  ;;  %v3390_v37 = vpop.f32.mrb[20].mxu1 }
 0x1e4   :  { %v814_v38 = vadd.f32 %v3390_v37, %v4191_v44  ;;  %v805_v39 = vpop.f32.mrb[21].mxu1 }
 0x1e5   :  { %v806_v40 = vadd.f32 %v4191_v44, %v805_v39  ;;  %v3391_v41 = vpop.f32.mrb[22].mxu1  ;;  %3464 = vmatprep.mubr.bf16.mxu0 %v1052_v36 }
 0x1e6   :  { %v817_v42 = vadd.f32 %v3391_v41, %v4191_v44  ;;  %v808_v43 = vpop.f32.mrb[23].mxu1  ;;  %3465 = vmatmul.mubr.bf16.gmra.mrb[80].mxu0 %v1053_v35  ;;  %v1002_v46 = vmax.f32 %v814_v38, 0.0 }
 0x1e7   :  { %v809_v45 = vadd.f32 %v4191_v44, %v808_v43  ;;  %v1000_v48 = vmax.f32 %v806_v40, 0.0 }
 0x1e8   :  { %v1003_v47 = vmax.f32 %v817_v42, 0.0 }
 0x1e9   :  { %v1001_v49 = vmax.f32 %v809_v45, 0.0 }
 0x1ea   :  { %v1055_v50 = vpack.c.bf16 %v1003_v47, %v1002_v46 }
 0x1eb   :  { %v1054_v51 = vpack.c.bf16 %v1001_v49, %v1000_v48  ;;  %v3394_v52 = vpop.f32.mrb[24].mxu1 }
 0x1ec   :  { %v830_v53 = vadd.f32 %v3394_v52, %v4191_v44  ;;  %v821_v54 = vpop.f32.mrb[25].mxu1 }
 0x1ed   :  { %v822_v55 = vadd.f32 %v4191_v44, %v821_v54  ;;  %v3395_v56 = vpop.f32.mrb[26].mxu1  ;;  %3468 = vmatprep.mubr.bf16.mxu0 %v1054_v51 }
 0x1ee   :  { %v833_v57 = vadd.f32 %v3395_v56, %v4191_v44  ;;  %v824_v58 = vpop.f32.mrb[27].mxu1  ;;  %3469 = vmatmul.mubr.bf16.gmra.mrb[84].mxu0 %v1055_v50  ;;  %v1006_v60 = vmax.f32 %v830_v53, 0.0 }
 0x1ef   :  { %v825_v59 = vadd.f32 %v4191_v44, %v824_v58  ;;  %v1004_v62 = vmax.f32 %v822_v55, 0.0 }
 0x1f0   :  { %v1007_v61 = vmax.f32 %v833_v57, 0.0 }
 0x1f1   :  { %v1005_v63 = vmax.f32 %v825_v59, 0.0 }
 0x1f2   :  { %v1057_v0 = vpack.c.bf16 %v1007_v61, %v1006_v60 }
 0x1f3   :  { %v1056_v1 = vpack.c.bf16 %v1005_v63, %v1004_v62  ;;  %v3398_v2 = vpop.f32.mrb[28].mxu1 }
 0x1f4   :  { %v846_v3 = vadd.f32 %v3398_v2, %v4191_v44  ;;  %v837_v4 = vpop.f32.mrb[29].mxu1 }
 0x1f5   :  { %v838_v5 = vadd.f32 %v4191_v44, %v837_v4  ;;  %v3399_v6 = vpop.f32.mrb[30].mxu1  ;;  %3472 = vmatprep.mubr.bf16.mxu0 %v1056_v1 }
 0x1f6   :  { %v849_v7 = vadd.f32 %v3399_v6, %v4191_v44  ;;  %v840_v8 = vpop.f32.mrb[31].mxu1  ;;  %3473 = vmatmul.mubr.bf16.gmra.mrb[88].mxu0 %v1057_v0  ;;  %v1010_v10 = vmax.f32 %v846_v3, 0.0 }
 0x1f7   :  { %v841_v9 = vadd.f32 %v4191_v44, %v840_v8  ;;  %v1008_v12 = vmax.f32 %v838_v5, 0.0 }
 0x1f8   :  { %v1011_v11 = vmax.f32 %v849_v7, 0.0 }
 0x1f9   :  { %v1009_v13 = vmax.f32 %v841_v9, 0.0 }
 0x1fa   :  { %v1059_v14 = vpack.c.bf16 %v1011_v11, %v1010_v10 }
 0x1fb   :  { %v1058_v15 = vpack.c.bf16 %v1009_v13, %v1008_v12  ;;  %v3402_v16 = vpop.f32.mrb[32].mxu1 }
 0x1fc   :  { %v862_v17 = vadd.f32 %v3402_v16, %v4191_v44  ;;  %v853_v18 = vpop.f32.mrb[33].mxu1 }
 0x1fd   :  { %v854_v19 = vadd.f32 %v4191_v44, %v853_v18  ;;  %v3403_v20 = vpop.f32.mrb[34].mxu1  ;;  %3476 = vmatprep.mubr.bf16.mxu0 %v1058_v15 }
 0x1fe   :  { %v865_v21 = vadd.f32 %v3403_v20, %v4191_v44  ;;  %v856_v22 = vpop.f32.mrb[35].mxu1  ;;  %3477 = vmatmul.mubr.bf16.gmra.mrb[92].mxu0 %v1059_v14  ;;  %v1014_v24 = vmax.f32 %v862_v17, 0.0 }
 0x1ff   :  { %v857_v23 = vadd.f32 %v4191_v44, %v856_v22  ;;  %v1012_v26 = vmax.f32 %v854_v19, 0.0 }
 0x200   :  { %v1015_v25 = vmax.f32 %v865_v21, 0.0 }
 0x201   :  { %v1013_v27 = vmax.f32 %v857_v23, 0.0 }
 0x202   :  { %v1061_v28 = vpack.c.bf16 %v1015_v25, %v1014_v24 }
 0x203   :  { %v1060_v29 = vpack.c.bf16 %v1013_v27, %v1012_v26  ;;  %v3406_v30 = vpop.f32.mrb[36].mxu1 }
 0x204   :  { %v878_v31 = vadd.f32 %v3406_v30, %v4191_v44  ;;  %v869_v32 = vpop.f32.mrb[37].mxu1 }
 0x205   :  { %v870_v33 = vadd.f32 %v4191_v44, %v869_v32  ;;  %v3407_v34 = vpop.f32.mrb[38].mxu1  ;;  %3480 = vmatprep.mubr.bf16.mxu0 %v1060_v29 }
 0x206   :  { %v881_v35 = vadd.f32 %v3407_v34, %v4191_v44  ;;  %v872_v36 = vpop.f32.mrb[39].mxu1  ;;  %3481 = vmatmul.mubr.bf16.gmra.mrb[96].mxu0 %v1061_v28  ;;  %v1018_v38 = vmax.f32 %v878_v31, 0.0 }
 0x207   :  { %v873_v37 = vadd.f32 %v4191_v44, %v872_v36  ;;  %v1016_v40 = vmax.f32 %v870_v33, 0.0 }
 0x208   :  { %v1019_v39 = vmax.f32 %v881_v35, 0.0 }
 0x209   :  { %v1017_v41 = vmax.f32 %v873_v37, 0.0 }
 0x20a   :  { %v1063_v42 = vpack.c.bf16 %v1019_v39, %v1018_v38 }
 0x20b   :  { %v1062_v43 = vpack.c.bf16 %v1017_v41, %v1016_v40  ;;  %v3410_v45 = vpop.f32.mrb[40].mxu1 }
 0x20c   :  { %v894_v46 = vadd.f32 %v3410_v45, %v4191_v44  ;;  %v885_v47 = vpop.f32.mrb[41].mxu1 }
 0x20d   :  { %v886_v48 = vadd.f32 %v4191_v44, %v885_v47  ;;  %v3411_v49 = vpop.f32.mrb[42].mxu1  ;;  %3484 = vmatprep.mubr.bf16.mxu0 %v1062_v43 }
 0x20e   :  { %v897_v50 = vadd.f32 %v3411_v49, %v4191_v44  ;;  %v888_v51 = vpop.f32.mrb[43].mxu1  ;;  %3485 = vmatmul.mubr.bf16.gmra.mrb[100].mxu0 %v1063_v42  ;;  %v1022_v53 = vmax.f32 %v894_v46, 0.0 }
 0x20f   :  { %v889_v52 = vadd.f32 %v4191_v44, %v888_v51  ;;  %v1020_v55 = vmax.f32 %v886_v48, 0.0 }
 0x210   :  { %v1023_v54 = vmax.f32 %v897_v50, 0.0 }
 0x211   :  { %v1021_v56 = vmax.f32 %v889_v52, 0.0 }
 0x212   :  { %v1065_v57 = vpack.c.bf16 %v1023_v54, %v1022_v53 }
 0x213   :  { %v1064_v58 = vpack.c.bf16 %v1021_v56, %v1020_v55  ;;  %v3414_v59 = vpop.f32.mrb[44].mxu1 }
 0x214   :  { %v910_v60 = vadd.f32 %v3414_v59, %v4191_v44  ;;  %v901_v61 = vpop.f32.mrb[45].mxu1 }
 0x215   :  { %v902_v62 = vadd.f32 %v4191_v44, %v901_v61  ;;  %v3415_v63 = vpop.f32.mrb[46].mxu1  ;;  %3488 = vmatprep.mubr.bf16.mxu0 %v1064_v58 }
 0x216   :  { %v913_v0 = vadd.f32 %v3415_v63, %v4191_v44  ;;  %v904_v1 = vpop.f32.mrb[47].mxu1  ;;  %3489 = vmatmul.mubr.bf16.gmra.mrb[104].mxu0 %v1065_v57  ;;  %v1026_v3 = vmax.f32 %v910_v60, 0.0 }
 0x217   :  { %v905_v2 = vadd.f32 %v4191_v44, %v904_v1  ;;  %v1024_v5 = vmax.f32 %v902_v62, 0.0 }
 0x218   :  { %v1027_v4 = vmax.f32 %v913_v0, 0.0 }
 0x219   :  { %v1025_v6 = vmax.f32 %v905_v2, 0.0  ;;  %v3794_v2 = vld [vmem:[%s5111_s1 + $0x100] sm:$0xff]  }
 0x21a   :  { %v1067_v7 = vpack.c.bf16 %v1027_v4, %v1026_v3  ;;  %3592 = vmatprep.subr.bf16.mxu0 %v3794_v2  ;;  %v3795_v3 = vld [vmem:[%s5111_s1 + $0x108] sm:$0xff]  }
 0x21b   :  { %v1066_v8 = vpack.c.bf16 %v1025_v6, %v1024_v5  ;;  %v3418_v9 = vpop.f32.mrb[48].mxu1  ;;  %3593 = vmatpush3.bf16.msra.mxu0 %v3794_v2 }
 0x21c   :  { %v926_v10 = vadd.f32 %v3418_v9, %v4191_v44  ;;  %v917_v11 = vpop.f32.mrb[49].mxu1  ;;  %3594 = vmatprep.subr.bf16.mxu0 %v3795_v3 }
 0x21d   :  { %v918_v12 = vadd.f32 %v4191_v44, %v917_v11  ;;  %v3419_v13 = vpop.f32.mrb[50].mxu1  ;;  %3492 = vmatprep.mubr.bf16.mxu0 %v1066_v8  ;;  %v3797_v8 = vld [vmem:[%s5111_s1 + $0x118] sm:$0xff]  }
 0x21e   :  { %v929_v14 = vadd.f32 %v3419_v13, %v4191_v44  ;;  %v920_v15 = vpop.f32.mrb[51].mxu1  ;;  %3493 = vmatmul.mubr.bf16.gmra.mrb[108].mxu0 %v1067_v7  ;;  %v1030_v17 = vmax.f32 %v926_v10, 0.0  ;;  %v3796_v7 = vld [vmem:[%s5111_s1 + $0x110] sm:$0xff]  }
 0x21f   :  { %v921_v16 = vadd.f32 %v4191_v44, %v920_v15  ;;  %v1028_v19 = vmax.f32 %v918_v12, 0.0  ;;  %3595 = vmatpush3.bf16.msra.mxu0 %v3795_v3  ;;  %v3798_v15 = vld [vmem:[%s5111_s1 + $0x120] sm:$0xff]  }
 0x220   :  { %v1031_v18 = vmax.f32 %v929_v14, 0.0  ;;  %3596 = vmatprep.subr.bf16.mxu0 %v3796_v7 }
 0x221   :  { %v1029_v20 = vmax.f32 %v921_v16, 0.0 }
 0x222   :  { %v1069_v21 = vpack.c.bf16 %v1031_v18, %v1030_v17 }
 0x223   :  { %v1068_v22 = vpack.c.bf16 %v1029_v20, %v1028_v19  ;;  %v3422_v23 = vpop.f32.mrb[52].mxu1  ;;  %3597 = vmatpush3.bf16.msra.mxu0 %v3796_v7  ;;  %v3799_v20 = vld [vmem:[%s5111_s1 + $0x128] sm:$0xff]  }
 0x224   :  { %v942_v24 = vadd.f32 %v3422_v23, %v4191_v44  ;;  %v933_v25 = vpop.f32.mrb[53].mxu1  ;;  %3598 = vmatprep.subr.bf16.mxu0 %v3797_v8 }
 0x225   :  { %v934_v26 = vadd.f32 %v4191_v44, %v933_v25  ;;  %v3423_v27 = vpop.f32.mrb[54].mxu1  ;;  %3496 = vmatprep.mubr.bf16.mxu0 %v1068_v22 }
 0x226   :  { %v945_v28 = vadd.f32 %v3423_v27, %v4191_v44  ;;  %v936_v29 = vpop.f32.mrb[55].mxu1  ;;  %3497 = vmatmul.mubr.bf16.gmra.mrb[112].mxu0 %v1069_v21  ;;  %v1034_v31 = vmax.f32 %v942_v24, 0.0  ;;  %v3800_v27 = vld [vmem:[%s5111_s1 + $0x130] sm:$0xff]  }
 0x227   :  { %v937_v30 = vadd.f32 %v4191_v44, %v936_v29  ;;  %v1032_v33 = vmax.f32 %v934_v26, 0.0  ;;  %3599 = vmatpush3.bf16.msra.mxu0 %v3797_v8 }
 0x228   :  { %v1035_v32 = vmax.f32 %v945_v28, 0.0  ;;  %3600 = vmatprep.subr.bf16.mxu0 %v3798_v15 }
 0x229   :  { %v1033_v34 = vmax.f32 %v937_v30, 0.0 }
 0x22a   :  { %v1071_v35 = vpack.c.bf16 %v1035_v32, %v1034_v31  ;;  %v3801_v32 = vld [vmem:[%s5111_s1 + $0x138] sm:$0xff]  }
 0x22b   :  { %v1070_v36 = vpack.c.bf16 %v1033_v34, %v1032_v33  ;;  %v3426_v37 = vpop.f32.mrb[56].mxu1  ;;  %3601 = vmatpush3.bf16.msra.mxu0 %v3798_v15 }
 0x22c   :  { %v958_v38 = vadd.f32 %v3426_v37, %v4191_v44  ;;  %v949_v39 = vpop.f32.mrb[57].mxu1  ;;  %3602 = vmatprep.subr.bf16.mxu0 %v3799_v20 }
 0x22d   :  { %v950_v40 = vadd.f32 %v4191_v44, %v949_v39  ;;  %v3427_v41 = vpop.f32.mrb[58].mxu1  ;;  %3500 = vmatprep.mubr.bf16.mxu0 %v1070_v36 }
 0x22e   :  { %v961_v42 = vadd.f32 %v3427_v41, %v4191_v44  ;;  %v952_v43 = vpop.f32.mrb[59].mxu1  ;;  %3501 = vmatmul.mubr.bf16.gmra.mrb[116].mxu0 %v1071_v35  ;;  %v1038_v46 = vmax.f32 %v958_v38, 0.0 }
 0x22f   :  { %v953_v45 = vadd.f32 %v4191_v44, %v952_v43  ;;  %v1036_v48 = vmax.f32 %v950_v40, 0.0  ;;  %3603 = vmatpush3.bf16.msra.mxu0 %v3799_v20 }
 0x230   :  { %v1039_v47 = vmax.f32 %v961_v42, 0.0  ;;  %3604 = vmatprep.subr.bf16.mxu0 %v3800_v27 }
 0x231   :  { %v1037_v49 = vmax.f32 %v953_v45, 0.0 }
 0x232   :  { %v1073_v50 = vpack.c.bf16 %v1039_v47, %v1038_v46 }
 0x233   :  { %v1072_v51 = vpack.c.bf16 %v1037_v49, %v1036_v48  ;;  %v3430_v52 = vpop.f32.mrb[60].mxu1  ;;  %3605 = vmatpush3.bf16.msra.mxu0 %v3800_v27 }
 0x234   :  { %v974_v53 = vadd.f32 %v3430_v52, %v4191_v44  ;;  %v965_v54 = vpop.f32.mrb[61].mxu1  ;;  %3606 = vmatprep.subr.bf16.mxu0 %v3801_v32 }
 0x235   :  { %v966_v55 = vadd.f32 %v4191_v44, %v965_v54  ;;  %v3431_v56 = vpop.f32.mrb[62].mxu1  ;;  %3504 = vmatprep.mubr.bf16.mxu0 %v1072_v51 }
 0x236   :  { %v977_v57 = vadd.f32 %v3431_v56, %v4191_v44  ;;  %v968_v58 = vpop.f32.mrb[63].mxu1  ;;  %3505 = vmatmul.mubr.bf16.gmra.mrb[120].mxu0 %v1073_v50  ;;  %v1042_v60 = vmax.f32 %v974_v53, 0.0 }
 0x237   :  { %v969_v59 = vadd.f32 %v4191_v44, %v968_v58  ;;  %v1040_v62 = vmax.f32 %v966_v55, 0.0  ;;  %v4284_v44 = vld [vmem:[%s5113_s2 + $0x2] ss:$0 sm:$0xff]  ;;  %3607 = vmatpush3.bf16.msra.mxu0 %v3801_v32 }
 0x238   :  { %v1043_v61 = vmax.f32 %v977_v57, 0.0 }
 0x239   :  { %v1041_v63 = vmax.f32 %v969_v59, 0.0 }
 0x23a   :  { %v1075_v0 = vpack.c.bf16 %v1043_v61, %v1042_v60 }
 0x23b   :  { %v1074_v1 = vpack.c.bf16 %v1041_v63, %v1040_v62 }
 0x23d   :  { %3508 = vmatprep.mubr.bf16.mxu0 %v1074_v1 }
 0x23e   :  { %3509 = vmatmul.mubr.bf16.gmra.mrb[124].mxu0 %v1075_v0 }
 0x299   :  { %v3450_v4 = vpop.f32.mrb[64].mxu0 }
 0x29a   :  { %v1192_v5 = vadd.f32 %v3450_v4, %v4284_v44  ;;  %v1183_v6 = vpop.f32.mrb[65].mxu0 }
 0x29b   :  { %v1184_v9 = vadd.f32 %v4284_v44, %v1183_v6  ;;  %v3451_v10 = vpop.f32.mrb[66].mxu0 }
 0x29c   :  { %1441 = vst.msk [vmem:[%s5114_s3 + $0x10] sm:$0xff] %vm1438_vm1, %v1192_v5  ;;  %v1195_v11 = vadd.f32 %v3451_v10, %v4284_v44  ;;  %v1186_v12 = vpop.f32.mrb[67].mxu0 }
 0x29d   :  { %1439 = vst.msk [vmem:[%s5114_s3] sm:$0xff] %vm1438_vm1, %v1184_v9  ;;  %v1187_v13 = vadd.f32 %v4284_v44, %v1186_v12 }
 0x29e   :  { %1442 = vst.msk [vmem:[%s5114_s3 + $0x18] sm:$0xff] %vm1438_vm1, %v1195_v11  ;;  %v1504_v14 = vpack.c.bf16 %v1195_v11, %v1192_v5 }
 0x29f   :  { %1440 = vst.msk [vmem:[%s5114_s3 + $0x8] sm:$0xff] %vm1438_vm1, %v1187_v13  ;;  %v1503_v16 = vpack.c.bf16 %v1187_v13, %v1184_v9 }
 0x2a1   :  { %v3454_v17 = vpop.f32.mrb[68].mxu0  ;;  %3528 = vmatprep.mubr.bf16.mxu1 %v1503_v16 }
 0x2a2   :  { %v1208_v18 = vadd.f32 %v3454_v17, %v4284_v44  ;;  %v1199_v19 = vpop.f32.mrb[69].mxu0  ;;  %3529 = vmatmul.mubr.bf16.vlgmr.msra.gmra.mrb[64].mxu1 %v1504_v14 }
 0x2a3   :  { %v1200_v21 = vadd.f32 %v4284_v44, %v1199_v19  ;;  %v3455_v22 = vpop.f32.mrb[70].mxu0 }
 0x2a4   :  { %1445 = vst.msk [vmem:[%s5114_s3 + $0x30] sm:$0xff] %vm1438_vm1, %v1208_v18  ;;  %v1211_v23 = vadd.f32 %v3455_v22, %v4284_v44  ;;  %v1202_v24 = vpop.f32.mrb[71].mxu0 }
 0x2a5   :  { %1443 = vst.msk [vmem:[%s5114_s3 + $0x20] sm:$0xff] %vm1438_vm1, %v1200_v21  ;;  %v1203_v25 = vadd.f32 %v4284_v44, %v1202_v24 }
 0x2a6   :  { %1446 = vst.msk [vmem:[%s5114_s3 + $0x38] sm:$0xff] %vm1438_vm1, %v1211_v23  ;;  %v1506_v26 = vpack.c.bf16 %v1211_v23, %v1208_v18 }
 0x2a7   :  { %1444 = vst.msk [vmem:[%s5114_s3 + $0x28] sm:$0xff] %vm1438_vm1, %v1203_v25  ;;  %v1505_v28 = vpack.c.bf16 %v1203_v25, %v1200_v21 }
 0x2a9   :  { %v3458_v29 = vpop.f32.mrb[72].mxu0  ;;  %3532 = vmatprep.mubr.bf16.mxu1 %v1505_v28 }
 0x2aa   :  { %v1224_v30 = vadd.f32 %v3458_v29, %v4284_v44  ;;  %v1215_v31 = vpop.f32.mrb[73].mxu0  ;;  %3533 = vmatmul.mubr.bf16.gmra.mrb[68].mxu1 %v1506_v26 }
 0x2ab   :  { %v1216_v33 = vadd.f32 %v4284_v44, %v1215_v31  ;;  %v3459_v34 = vpop.f32.mrb[74].mxu0 }
 0x2ac   :  { %1449 = vst.msk [vmem:[%s5114_s3 + $0x50] sm:$0xff] %vm1438_vm1, %v1224_v30  ;;  %v1227_v35 = vadd.f32 %v3459_v34, %v4284_v44  ;;  %v1218_v36 = vpop.f32.mrb[75].mxu0 }
 0x2ad   :  { %1447 = vst.msk [vmem:[%s5114_s3 + $0x40] sm:$0xff] %vm1438_vm1, %v1216_v33  ;;  %v1219_v37 = vadd.f32 %v4284_v44, %v1218_v36 }
 0x2ae   :  { %1450 = vst.msk [vmem:[%s5114_s3 + $0x58] sm:$0xff] %vm1438_vm1, %v1227_v35  ;;  %v1508_v38 = vpack.c.bf16 %v1227_v35, %v1224_v30 }
 0x2af   :  { %1448 = vst.msk [vmem:[%s5114_s3 + $0x48] sm:$0xff] %vm1438_vm1, %v1219_v37  ;;  %v1507_v39 = vpack.c.bf16 %v1219_v37, %v1216_v33 }
 0x2b1   :  { %v3462_v40 = vpop.f32.mrb[76].mxu0  ;;  %3536 = vmatprep.mubr.bf16.mxu1 %v1507_v39 }
 0x2b2   :  { %v1240_v41 = vadd.f32 %v3462_v40, %v4284_v44  ;;  %v1231_v42 = vpop.f32.mrb[77].mxu0  ;;  %3537 = vmatmul.mubr.bf16.gmra.mrb[72].mxu1 %v1508_v38 }
 0x2b3   :  { %v1232_v43 = vadd.f32 %v4284_v44, %v1231_v42  ;;  %v3463_v45 = vpop.f32.mrb[78].mxu0 }
 0x2b4   :  { %1453 = vst.msk [vmem:[%s5114_s3 + $0x70] sm:$0xff] %vm1438_vm1, %v1240_v41  ;;  %v1243_v46 = vadd.f32 %v3463_v45, %v4284_v44  ;;  %v1234_v47 = vpop.f32.mrb[79].mxu0 }
 0x2b5   :  { %1451 = vst.msk [vmem:[%s5114_s3 + $0x60] sm:$0xff] %vm1438_vm1, %v1232_v43  ;;  %v1235_v48 = vadd.f32 %v4284_v44, %v1234_v47 }
 0x2b6   :  { %1454 = vst.msk [vmem:[%s5114_s3 + $0x78] sm:$0xff] %vm1438_vm1, %v1243_v46  ;;  %v1510_v49 = vpack.c.bf16 %v1243_v46, %v1240_v41 }
 0x2b7   :  { %1452 = vst.msk [vmem:[%s5114_s3 + $0x68] sm:$0xff] %vm1438_vm1, %v1235_v48  ;;  %v1509_v50 = vpack.c.bf16 %v1235_v48, %v1232_v43 }
 0x2b9   :  { %v3466_v51 = vpop.f32.mrb[80].mxu0  ;;  %3540 = vmatprep.mubr.bf16.mxu1 %v1509_v50 }
 0x2ba   :  { %v1256_v52 = vadd.f32 %v3466_v51, %v4284_v44  ;;  %v1247_v53 = vpop.f32.mrb[81].mxu0  ;;  %3541 = vmatmul.mubr.bf16.gmra.mrb[76].mxu1 %v1510_v49 }
 0x2bb   :  { %v1248_v54 = vadd.f32 %v4284_v44, %v1247_v53  ;;  %v3467_v55 = vpop.f32.mrb[82].mxu0 }
 0x2bc   :  { %1457 = vst.msk [vmem:[%s5114_s3 + $0x90] sm:$0xff] %vm1438_vm1, %v1256_v52  ;;  %v1259_v56 = vadd.f32 %v3467_v55, %v4284_v44  ;;  %v1250_v57 = vpop.f32.mrb[83].mxu0 }
 0x2bd   :  { %1455 = vst.msk [vmem:[%s5114_s3 + $0x80] sm:$0xff] %vm1438_vm1, %v1248_v54  ;;  %v1251_v58 = vadd.f32 %v4284_v44, %v1250_v57 }
 0x2be   :  { %1458 = vst.msk [vmem:[%s5114_s3 + $0x98] sm:$0xff] %vm1438_vm1, %v1259_v56  ;;  %v1512_v59 = vpack.c.bf16 %v1259_v56, %v1256_v52 }
 0x2bf   :  { %1456 = vst.msk [vmem:[%s5114_s3 + $0x88] sm:$0xff] %vm1438_vm1, %v1251_v58  ;;  %v1511_v60 = vpack.c.bf16 %v1251_v58, %v1248_v54 }
 0x2c1   :  { %v3470_v61 = vpop.f32.mrb[84].mxu0  ;;  %3544 = vmatprep.mubr.bf16.mxu1 %v1511_v60 }
 0x2c2   :  { %v1272_v62 = vadd.f32 %v3470_v61, %v4284_v44  ;;  %v1263_v63 = vpop.f32.mrb[85].mxu0  ;;  %3545 = vmatmul.mubr.bf16.gmra.mrb[80].mxu1 %v1512_v59 }
 0x2c3   :  { %v1264_v0 = vadd.f32 %v4284_v44, %v1263_v63  ;;  %v3471_v1 = vpop.f32.mrb[86].mxu0 }
 0x2c4   :  { %1461 = vst.msk [vmem:[%s5114_s3 + $0xb0] sm:$0xff] %vm1438_vm1, %v1272_v62  ;;  %v1275_v2 = vadd.f32 %v3471_v1, %v4284_v44  ;;  %v1266_v3 = vpop.f32.mrb[87].mxu0 }
 0x2c5   :  { %1459 = vst.msk [vmem:[%s5114_s3 + $0xa0] sm:$0xff] %vm1438_vm1, %v1264_v0  ;;  %v1267_v4 = vadd.f32 %v4284_v44, %v1266_v3 }
 0x2c6   :  { %1462 = vst.msk [vmem:[%s5114_s3 + $0xb8] sm:$0xff] %vm1438_vm1, %v1275_v2  ;;  %v1514_v5 = vpack.c.bf16 %v1275_v2, %v1272_v62 }
 0x2c7   :  { %1460 = vst.msk [vmem:[%s5114_s3 + $0xa8] sm:$0xff] %vm1438_vm1, %v1267_v4  ;;  %v1513_v6 = vpack.c.bf16 %v1267_v4, %v1264_v0 }
 0x2c9   :  { %v3474_v7 = vpop.f32.mrb[88].mxu0  ;;  %3548 = vmatprep.mubr.bf16.mxu1 %v1513_v6 }
 0x2ca   :  { %v1288_v8 = vadd.f32 %v3474_v7, %v4284_v44  ;;  %v1279_v9 = vpop.f32.mrb[89].mxu0  ;;  %3549 = vmatmul.mubr.bf16.gmra.mrb[84].mxu1 %v1514_v5 }
 0x2cb   :  { %v1280_v10 = vadd.f32 %v4284_v44, %v1279_v9  ;;  %v3475_v11 = vpop.f32.mrb[90].mxu0 }
 0x2cc   :  { %1465 = vst.msk [vmem:[%s5114_s3 + $0xd0] sm:$0xff] %vm1438_vm1, %v1288_v8  ;;  %v1291_v12 = vadd.f32 %v3475_v11, %v4284_v44  ;;  %v1282_v13 = vpop.f32.mrb[91].mxu0 }
 0x2cd   :  { %1463 = vst.msk [vmem:[%s5114_s3 + $0xc0] sm:$0xff] %vm1438_vm1, %v1280_v10  ;;  %v1283_v14 = vadd.f32 %v4284_v44, %v1282_v13 }
 0x2ce   :  { %1466 = vst.msk [vmem:[%s5114_s3 + $0xd8] sm:$0xff] %vm1438_vm1, %v1291_v12  ;;  %v1516_v15 = vpack.c.bf16 %v1291_v12, %v1288_v8 }
 0x2cf   :  { %1464 = vst.msk [vmem:[%s5114_s3 + $0xc8] sm:$0xff] %vm1438_vm1, %v1283_v14  ;;  %v1515_v16 = vpack.c.bf16 %v1283_v14, %v1280_v10 }
 0x2d1   :  { %v3478_v17 = vpop.f32.mrb[92].mxu0  ;;  %3552 = vmatprep.mubr.bf16.mxu1 %v1515_v16 }
 0x2d2   :  { %v1304_v18 = vadd.f32 %v3478_v17, %v4284_v44  ;;  %v1295_v19 = vpop.f32.mrb[93].mxu0  ;;  %3553 = vmatmul.mubr.bf16.gmra.mrb[88].mxu1 %v1516_v15 }
 0x2d3   :  { %v1296_v20 = vadd.f32 %v4284_v44, %v1295_v19  ;;  %v3479_v21 = vpop.f32.mrb[94].mxu0 }
 0x2d4   :  { %1469 = vst.msk [vmem:[%s5114_s3 + $0xf0] sm:$0xff] %vm1438_vm1, %v1304_v18  ;;  %v1307_v22 = vadd.f32 %v3479_v21, %v4284_v44  ;;  %v1298_v23 = vpop.f32.mrb[95].mxu0 }
 0x2d5   :  { %1467 = vst.msk [vmem:[%s5114_s3 + $0xe0] sm:$0xff] %vm1438_vm1, %v1296_v20  ;;  %v1299_v24 = vadd.f32 %v4284_v44, %v1298_v23 }
 0x2d6   :  { %1470 = vst.msk [vmem:[%s5114_s3 + $0xf8] sm:$0xff] %vm1438_vm1, %v1307_v22  ;;  %v1518_v25 = vpack.c.bf16 %v1307_v22, %v1304_v18 }
 0x2d7   :  { %1468 = vst.msk [vmem:[%s5114_s3 + $0xe8] sm:$0xff] %vm1438_vm1, %v1299_v24  ;;  %v1517_v26 = vpack.c.bf16 %v1299_v24, %v1296_v20 }
 0x2d9   :  { %v3482_v27 = vpop.f32.mrb[96].mxu0  ;;  %3556 = vmatprep.mubr.bf16.mxu1 %v1517_v26 }
 0x2da   :  { %v1320_v28 = vadd.f32 %v3482_v27, %v4284_v44  ;;  %v1311_v29 = vpop.f32.mrb[97].mxu0  ;;  %3557 = vmatmul.mubr.bf16.gmra.mrb[92].mxu1 %v1518_v25 }
 0x2db   :  { %v1312_v30 = vadd.f32 %v4284_v44, %v1311_v29  ;;  %v3483_v31 = vpop.f32.mrb[98].mxu0 }
 0x2dc   :  { %1473 = vst.msk [vmem:[%s5114_s3 + $0x110] sm:$0xff] %vm1438_vm1, %v1320_v28  ;;  %v1323_v32 = vadd.f32 %v3483_v31, %v4284_v44  ;;  %v1314_v33 = vpop.f32.mrb[99].mxu0 }
 0x2dd   :  { %1471 = vst.msk [vmem:[%s5114_s3 + $0x100] sm:$0xff] %vm1438_vm1, %v1312_v30  ;;  %v1315_v34 = vadd.f32 %v4284_v44, %v1314_v33 }
 0x2de   :  { %1474 = vst.msk [vmem:[%s5114_s3 + $0x118] sm:$0xff] %vm1438_vm1, %v1323_v32  ;;  %v1520_v35 = vpack.c.bf16 %v1323_v32, %v1320_v28 }
 0x2df   :  { %1472 = vst.msk [vmem:[%s5114_s3 + $0x108] sm:$0xff] %vm1438_vm1, %v1315_v34  ;;  %v1519_v36 = vpack.c.bf16 %v1315_v34, %v1312_v30 }
 0x2e1   :  { %v3486_v37 = vpop.f32.mrb[100].mxu0  ;;  %3560 = vmatprep.mubr.bf16.mxu1 %v1519_v36 }
 0x2e2   :  { %v1336_v38 = vadd.f32 %v3486_v37, %v4284_v44  ;;  %v1327_v39 = vpop.f32.mrb[101].mxu0  ;;  %3561 = vmatmul.mubr.bf16.gmra.mrb[96].mxu1 %v1520_v35 }
 0x2e3   :  { %v1328_v40 = vadd.f32 %v4284_v44, %v1327_v39  ;;  %v3487_v41 = vpop.f32.mrb[102].mxu0 }
 0x2e4   :  { %1477 = vst.msk [vmem:[%s5114_s3 + $0x130] sm:$0xff] %vm1438_vm1, %v1336_v38  ;;  %v1339_v42 = vadd.f32 %v3487_v41, %v4284_v44  ;;  %v1330_v43 = vpop.f32.mrb[103].mxu0 }
 0x2e5   :  { %1475 = vst.msk [vmem:[%s5114_s3 + $0x120] sm:$0xff] %vm1438_vm1, %v1328_v40  ;;  %v1331_v45 = vadd.f32 %v4284_v44, %v1330_v43 }
 0x2e6   :  { %1478 = vst.msk [vmem:[%s5114_s3 + $0x138] sm:$0xff] %vm1438_vm1, %v1339_v42  ;;  %v1522_v46 = vpack.c.bf16 %v1339_v42, %v1336_v38 }
 0x2e7   :  { %1476 = vst.msk [vmem:[%s5114_s3 + $0x128] sm:$0xff] %vm1438_vm1, %v1331_v45  ;;  %v1521_v47 = vpack.c.bf16 %v1331_v45, %v1328_v40  ;;  %v3802_v45 = vld [vmem:[%s5111_s1 + $0x140] sm:$0xff]  }
 0x2e8   :  { %3752 = vmatprep.subr.bf16.mxu1 %v3802_v45  ;;  %3672 = vmatprep.subr.bf16.mxu0 %v3802_v45 }
 0x2e9   :  { %v3490_v48 = vpop.f32.mrb[104].mxu0  ;;  %3564 = vmatprep.mubr.bf16.mxu1 %v1521_v47  ;;  %3760 = vmatpush3.bf16.msra.mxu1 %v3802_v45  ;;  %v3803_v47 = vld [vmem:[%s5111_s1 + $0x148] sm:$0xff]  }
 0x2ea   :  { %v1352_v49 = vadd.f32 %v3490_v48, %v4284_v44  ;;  %v1343_v50 = vpop.f32.mrb[105].mxu0  ;;  %3565 = vmatmul.mubr.bf16.gmra.mrb[100].mxu1 %v1522_v46  ;;  %3753 = vmatprep.subr.bf16.mxu1 %v3803_v47 }
 0x2eb   :  { %v1344_v51 = vadd.f32 %v4284_v44, %v1343_v50  ;;  %v3491_v52 = vpop.f32.mrb[106].mxu0 }
 0x2ec   :  { %1481 = vst.msk [vmem:[%s5114_s3 + $0x150] sm:$0xff] %vm1438_vm1, %v1352_v49  ;;  %v1355_v53 = vadd.f32 %v3491_v52, %v4284_v44  ;;  %v1346_v54 = vpop.f32.mrb[107].mxu0 }
 0x2ed   :  { %1479 = vst.msk [vmem:[%s5114_s3 + $0x140] sm:$0xff] %vm1438_vm1, %v1344_v51  ;;  %v1347_v55 = vadd.f32 %v4284_v44, %v1346_v54  ;;  %3761 = vmatpush3.bf16.msra.mxu1 %v3803_v47  ;;  %v3804_v54 = vld [vmem:[%s5111_s1 + $0x150] sm:$0xff]  }
 0x2ee   :  { %1482 = vst.msk [vmem:[%s5114_s3 + $0x158] sm:$0xff] %vm1438_vm1, %v1355_v53  ;;  %v1524_v56 = vpack.c.bf16 %v1355_v53, %v1352_v49  ;;  %3754 = vmatprep.subr.bf16.mxu1 %v3804_v54 }
 0x2ef   :  { %1480 = vst.msk [vmem:[%s5114_s3 + $0x148] sm:$0xff] %vm1438_vm1, %v1347_v55  ;;  %v1523_v57 = vpack.c.bf16 %v1347_v55, %v1344_v51 }
 0x2f1   :  { %v3494_v58 = vpop.f32.mrb[108].mxu0  ;;  %3568 = vmatprep.mubr.bf16.mxu1 %v1523_v57  ;;  %3762 = vmatpush3.bf16.msra.mxu1 %v3804_v54 }
 0x2f2   :  { %v1368_v59 = vadd.f32 %v3494_v58, %v4284_v44  ;;  %v1359_v60 = vpop.f32.mrb[109].mxu0  ;;  %3569 = vmatmul.mubr.bf16.gmra.mrb[104].mxu1 %v1524_v56 }
 0x2f3   :  { %v1360_v61 = vadd.f32 %v4284_v44, %v1359_v60  ;;  %v3495_v62 = vpop.f32.mrb[110].mxu0  ;;  %v3805_v60 = vld [vmem:[%s5111_s1 + $0x158] sm:$0xff]  }
 0x2f4   :  { %1485 = vst.msk [vmem:[%s5114_s3 + $0x170] sm:$0xff] %vm1438_vm1, %v1368_v59  ;;  %v1371_v63 = vadd.f32 %v3495_v62, %v4284_v44  ;;  %v1362_v0 = vpop.f32.mrb[111].mxu0  ;;  %3755 = vmatprep.subr.bf16.mxu1 %v3805_v60 }
 0x2f5   :  { %1483 = vst.msk [vmem:[%s5114_s3 + $0x160] sm:$0xff] %vm1438_vm1, %v1360_v61  ;;  %v1363_v1 = vadd.f32 %v4284_v44, %v1362_v0  ;;  %3763 = vmatpush3.bf16.msra.mxu1 %v3805_v60 }
 0x2f6   :  { %1486 = vst.msk [vmem:[%s5114_s3 + $0x178] sm:$0xff] %vm1438_vm1, %v1371_v63  ;;  %v1526_v2 = vpack.c.bf16 %v1371_v63, %v1368_v59 }
 0x2f7   :  { %1484 = vst.msk [vmem:[%s5114_s3 + $0x168] sm:$0xff] %vm1438_vm1, %v1363_v1  ;;  %v1525_v3 = vpack.c.bf16 %v1363_v1, %v1360_v61 }
 0x2f9   :  { %v3498_v4 = vpop.f32.mrb[112].mxu0  ;;  %3572 = vmatprep.mubr.bf16.mxu1 %v1525_v3 }
 0x2fa   :  { %v1384_v5 = vadd.f32 %v3498_v4, %v4284_v44  ;;  %v1375_v6 = vpop.f32.mrb[113].mxu0  ;;  %3573 = vmatmul.mubr.bf16.gmra.mrb[108].mxu1 %v1526_v2  ;;  %v3806_v4 = vld [vmem:[%s5111_s1 + $0x160] sm:$0xff]  }
 0x2fb   :  { %v1376_v7 = vadd.f32 %v4284_v44, %v1375_v6  ;;  %v3499_v8 = vpop.f32.mrb[114].mxu0  ;;  %3756 = vmatprep.subr.bf16.mxu1 %v3806_v4 }
 0x2fc   :  { %1489 = vst.msk [vmem:[%s5114_s3 + $0x190] sm:$0xff] %vm1438_vm1, %v1384_v5  ;;  %v1387_v9 = vadd.f32 %v3499_v8, %v4284_v44  ;;  %v1378_v10 = vpop.f32.mrb[115].mxu0  ;;  %3764 = vmatpush3.bf16.msra.mxu1 %v3806_v4 }
 0x2fd   :  { %1487 = vst.msk [vmem:[%s5114_s3 + $0x180] sm:$0xff] %vm1438_vm1, %v1376_v7  ;;  %v1379_v11 = vadd.f32 %v4284_v44, %v1378_v10 }
 0x2fe   :  { %1490 = vst.msk [vmem:[%s5114_s3 + $0x198] sm:$0xff] %vm1438_vm1, %v1387_v9  ;;  %v1528_v12 = vpack.c.bf16 %v1387_v9, %v1384_v5 }
 0x2ff   :  { %1488 = vst.msk [vmem:[%s5114_s3 + $0x188] sm:$0xff] %vm1438_vm1, %v1379_v11  ;;  %v1527_v13 = vpack.c.bf16 %v1379_v11, %v1376_v7 }
 0x301   :  { %v3502_v14 = vpop.f32.mrb[116].mxu0  ;;  %3576 = vmatprep.mubr.bf16.mxu1 %v1527_v13 }
 0x302   :  { %v1400_v15 = vadd.f32 %v3502_v14, %v4284_v44  ;;  %v1391_v16 = vpop.f32.mrb[117].mxu0  ;;  %3577 = vmatmul.mubr.bf16.gmra.mrb[112].mxu1 %v1528_v12  ;;  %v3807_v12 = vld [vmem:[%s5111_s1 + $0x168] sm:$0xff]  }
 0x303   :  { %v1392_v17 = vadd.f32 %v4284_v44, %v1391_v16  ;;  %v3503_v18 = vpop.f32.mrb[118].mxu0  ;;  %3757 = vmatprep.subr.bf16.mxu1 %v3807_v12 }
 0x304   :  { %1493 = vst.msk [vmem:[%s5114_s3 + $0x1b0] sm:$0xff] %vm1438_vm1, %v1400_v15  ;;  %v1403_v19 = vadd.f32 %v3503_v18, %v4284_v44  ;;  %v1394_v20 = vpop.f32.mrb[119].mxu0  ;;  %3765 = vmatpush3.bf16.msra.mxu1 %v3807_v12 }
 0x305   :  { %1491 = vst.msk [vmem:[%s5114_s3 + $0x1a0] sm:$0xff] %vm1438_vm1, %v1392_v17  ;;  %v1395_v21 = vadd.f32 %v4284_v44, %v1394_v20  ;;  %v3808_v20 = vld [vmem:[%s5111_s1 + $0x170] sm:$0xff]  }
 0x306   :  { %1494 = vst.msk [vmem:[%s5114_s3 + $0x1b8] sm:$0xff] %vm1438_vm1, %v1403_v19  ;;  %v1530_v22 = vpack.c.bf16 %v1403_v19, %v1400_v15  ;;  %3758 = vmatprep.subr.bf16.mxu1 %v3808_v20 }
 0x307   :  { %1492 = vst.msk [vmem:[%s5114_s3 + $0x1a8] sm:$0xff] %vm1438_vm1, %v1395_v21  ;;  %v1529_v23 = vpack.c.bf16 %v1395_v21, %v1392_v17 }
 0x308   :  { %3766 = vmatpush3.bf16.msra.mxu1 %v3808_v20 }
 0x309   :  { %v3506_v24 = vpop.f32.mrb[120].mxu0  ;;  %3580 = vmatprep.mubr.bf16.mxu1 %v1529_v23 }
 0x30a   :  { %v1416_v25 = vadd.f32 %v3506_v24, %v4284_v44  ;;  %v1407_v26 = vpop.f32.mrb[121].mxu0  ;;  %3581 = vmatmul.mubr.bf16.gmra.mrb[116].mxu1 %v1530_v22 }
 0x30b   :  { %v1408_v27 = vadd.f32 %v4284_v44, %v1407_v26  ;;  %v3507_v28 = vpop.f32.mrb[122].mxu0 }
 0x30c   :  { %1497 = vst.msk [vmem:[%s5114_s3 + $0x1d0] sm:$0xff] %vm1438_vm1, %v1416_v25  ;;  %v1419_v29 = vadd.f32 %v3507_v28, %v4284_v44  ;;  %v1410_v30 = vpop.f32.mrb[123].mxu0 }
 0x30d   :  { %1495 = vst.msk [vmem:[%s5114_s3 + $0x1c0] sm:$0xff] %vm1438_vm1, %v1408_v27  ;;  %v1411_v31 = vadd.f32 %v4284_v44, %v1410_v30 }
 0x30e   :  { %1498 = vst.msk [vmem:[%s5114_s3 + $0x1d8] sm:$0xff] %vm1438_vm1, %v1419_v29  ;;  %v1532_v32 = vpack.c.bf16 %v1419_v29, %v1416_v25 }
 0x30f   :  { %1496 = vst.msk [vmem:[%s5114_s3 + $0x1c8] sm:$0xff] %vm1438_vm1, %v1411_v31  ;;  %v1531_v33 = vpack.c.bf16 %v1411_v31, %v1408_v27 }
 0x311   :  { %v3510_v34 = vpop.f32.mrb[124].mxu0  ;;  %3584 = vmatprep.mubr.bf16.mxu1 %v1531_v33 }
 0x312   :  { %v1432_v35 = vadd.f32 %v3510_v34, %v4284_v44  ;;  %v1423_v36 = vpop.f32.mrb[125].mxu0  ;;  %3585 = vmatmul.mubr.bf16.gmra.mrb[120].mxu1 %v1532_v32 }
 0x313   :  { %v1424_v37 = vadd.f32 %v4284_v44, %v1423_v36  ;;  %v3511_v38 = vpop.f32.mrb[126].mxu0 }
 0x314   :  { %1501 = vst.msk [vmem:[%s5114_s3 + $0x1f0] sm:$0xff] %vm1438_vm1, %v1432_v35  ;;  %v1435_v39 = vadd.f32 %v3511_v38, %v4284_v44  ;;  %v1426_v40 = vpop.f32.mrb[127].mxu0 }
 0x315   :  { %1499 = vst.msk [vmem:[%s5114_s3 + $0x1e0] sm:$0xff] %vm1438_vm1, %v1424_v37  ;;  %v1427_v41 = vadd.f32 %v4284_v44, %v1426_v40  ;;  %v4630_v44 = vld [vmem:[%s5113_s2 + $0x3] ss:$0 sm:$0xff] }
 0x316   :  { %1502 = vst.msk [vmem:[%s5114_s3 + $0x1f8] sm:$0xff] %vm1438_vm1, %v1435_v39  ;;  %v1534_v42 = vpack.c.bf16 %v1435_v39, %v1432_v35 }
 0x317   :  { %1500 = vst.msk [vmem:[%s5114_s3 + $0x1e8] sm:$0xff] %vm1438_vm1, %v1427_v41  ;;  %v1533_v43 = vpack.c.bf16 %v1427_v41, %v1424_v37 }
 0x319   :  { %3588 = vmatprep.mubr.bf16.mxu1 %v1533_v43 }
 0x31a   :  { %3589 = vmatmul.mubr.bf16.gmra.mrb[124].mxu1 %v1534_v42 }
 0x375   :  { %v3530_v46 = vpop.f32.mrb[64].mxu1 }
 0x376   :  { %v1651_v48 = vadd.f32 %v3530_v46, %v4630_v44  ;;  %v1642_v49 = vpop.f32.mrb[65].mxu1 }
 0x377   :  { %v1643_v50 = vadd.f32 %v4630_v44, %v1642_v49  ;;  %v3531_v51 = vpop.f32.mrb[66].mxu1 }
 0x378   :  { %v1654_v52 = vadd.f32 %v3531_v51, %v4630_v44  ;;  %v1645_v53 = vpop.f32.mrb[67].mxu1  ;;  %v1899_v56 = vmax.f32 %v1651_v48, 0.0 }
 0x379   :  { %v1646_v55 = vadd.f32 %v4630_v44, %v1645_v53  ;;  %v1897_v58 = vmax.f32 %v1643_v50, 0.0 }
 0x37a   :  { %v1900_v57 = vmax.f32 %v1654_v52, 0.0 }
 0x37b   :  { %v1898_v59 = vmax.f32 %v1646_v55, 0.0 }
 0x37c   :  { %v1962_v61 = vpack.c.bf16 %v1900_v57, %v1899_v56 }
 0x37d   :  { %v1961_v62 = vpack.c.bf16 %v1898_v59, %v1897_v58  ;;  %v3534_v63 = vpop.f32.mrb[68].mxu1 }
 0x37e   :  { %v1667_v0 = vadd.f32 %v3534_v63, %v4630_v44  ;;  %v1658_v1 = vpop.f32.mrb[69].mxu1 }
 0x37f   :  { %v1659_v2 = vadd.f32 %v4630_v44, %v1658_v1  ;;  %v3535_v3 = vpop.f32.mrb[70].mxu1  ;;  %3608 = vmatprep.mubr.bf16.mxu0 %v1961_v62 }
 0x380   :  { %v1670_v5 = vadd.f32 %v3535_v3, %v4630_v44  ;;  %v1661_v6 = vpop.f32.mrb[71].mxu1  ;;  %3609 = vmatmul.mubr.bf16.vlgmr.msra.gmra.mrb[128].mxu0 %v1962_v61  ;;  %v1903_v8 = vmax.f32 %v1667_v0, 0.0 }
 0x381   :  { %v1662_v7 = vadd.f32 %v4630_v44, %v1661_v6  ;;  %3673 = vmatpush3.bf16.msra.mxu0 %v3802_v45  ;;  %v1901_v10 = vmax.f32 %v1659_v2, 0.0 }
 0x382   :  { %v1904_v9 = vmax.f32 %v1670_v5, 0.0  ;;  %3674 = vmatprep.subr.bf16.mxu0 %v3803_v47 }
 0x383   :  { %v1902_v11 = vmax.f32 %v1662_v7, 0.0 }
 0x384   :  { %v1964_v13 = vpack.c.bf16 %v1904_v9, %v1903_v8 }
 0x385   :  { %v1963_v14 = vpack.c.bf16 %v1902_v11, %v1901_v10  ;;  %v3538_v15 = vpop.f32.mrb[72].mxu1  ;;  %3675 = vmatpush3.bf16.msra.mxu0 %v3803_v47 }
 0x386   :  { %v1683_v16 = vadd.f32 %v3538_v15, %v4630_v44  ;;  %v1674_v17 = vpop.f32.mrb[73].mxu1  ;;  %3676 = vmatprep.subr.bf16.mxu0 %v3804_v54 }
 0x387   :  { %v1675_v18 = vadd.f32 %v4630_v44, %v1674_v17  ;;  %v3539_v19 = vpop.f32.mrb[74].mxu1  ;;  %3612 = vmatprep.mubr.bf16.mxu0 %v1963_v14 }
 0x388   :  { %v1686_v21 = vadd.f32 %v3539_v19, %v4630_v44  ;;  %v1677_v22 = vpop.f32.mrb[75].mxu1  ;;  %3613 = vmatmul.mubr.bf16.gmra.mrb[132].mxu0 %v1964_v13  ;;  %v1907_v24 = vmax.f32 %v1683_v16, 0.0 }
 0x389   :  { %v1678_v23 = vadd.f32 %v4630_v44, %v1677_v22  ;;  %3677 = vmatpush3.bf16.msra.mxu0 %v3804_v54  ;;  %v1905_v26 = vmax.f32 %v1675_v18, 0.0 }
 0x38a   :  { %v1908_v25 = vmax.f32 %v1686_v21, 0.0  ;;  %3678 = vmatprep.subr.bf16.mxu0 %v3805_v60 }
 0x38b   :  { %v1906_v27 = vmax.f32 %v1678_v23, 0.0 }
 0x38c   :  { %v1966_v28 = vpack.c.bf16 %v1908_v25, %v1907_v24 }
 0x38d   :  { %v1965_v29 = vpack.c.bf16 %v1906_v27, %v1905_v26  ;;  %v3542_v30 = vpop.f32.mrb[76].mxu1  ;;  %3679 = vmatpush3.bf16.msra.mxu0 %v3805_v60 }
 0x38e   :  { %v1699_v31 = vadd.f32 %v3542_v30, %v4630_v44  ;;  %v1690_v32 = vpop.f32.mrb[77].mxu1  ;;  %3680 = vmatprep.subr.bf16.mxu0 %v3806_v4 }
 0x38f   :  { %v1691_v33 = vadd.f32 %v4630_v44, %v1690_v32  ;;  %v3543_v34 = vpop.f32.mrb[78].mxu1  ;;  %3616 = vmatprep.mubr.bf16.mxu0 %v1965_v29 }
 0x390   :  { %v1702_v35 = vadd.f32 %v3543_v34, %v4630_v44  ;;  %v1693_v36 = vpop.f32.mrb[79].mxu1  ;;  %3617 = vmatmul.mubr.bf16.gmra.mrb[136].mxu0 %v1966_v28  ;;  %v1911_v38 = vmax.f32 %v1699_v31, 0.0 }
 0x391   :  { %v1694_v37 = vadd.f32 %v4630_v44, %v1693_v36  ;;  %3681 = vmatpush3.bf16.msra.mxu0 %v3806_v4  ;;  %v1909_v40 = vmax.f32 %v1691_v33, 0.0 }
 0x392   :  { %v1912_v39 = vmax.f32 %v1702_v35, 0.0  ;;  %3682 = vmatprep.subr.bf16.mxu0 %v3807_v12 }
 0x393   :  { %v1910_v41 = vmax.f32 %v1694_v37, 0.0 }
 0x394   :  { %v1968_v42 = vpack.c.bf16 %v1912_v39, %v1911_v38 }
 0x395   :  { %v1967_v43 = vpack.c.bf16 %v1910_v41, %v1909_v40  ;;  %v3546_v45 = vpop.f32.mrb[80].mxu1  ;;  %3683 = vmatpush3.bf16.msra.mxu0 %v3807_v12 }
 0x396   :  { %v1715_v46 = vadd.f32 %v3546_v45, %v4630_v44  ;;  %v1706_v47 = vpop.f32.mrb[81].mxu1  ;;  %3684 = vmatprep.subr.bf16.mxu0 %v3808_v20 }
 0x397   :  { %v1707_v48 = vadd.f32 %v4630_v44, %v1706_v47  ;;  %v3547_v49 = vpop.f32.mrb[82].mxu1  ;;  %3620 = vmatprep.mubr.bf16.mxu0 %v1967_v43 }
 0x398   :  { %v1718_v50 = vadd.f32 %v3547_v49, %v4630_v44  ;;  %v1709_v51 = vpop.f32.mrb[83].mxu1  ;;  %3621 = vmatmul.mubr.bf16.gmra.mrb[140].mxu0 %v1968_v42  ;;  %v1915_v53 = vmax.f32 %v1715_v46, 0.0 }
 0x399   :  { %v1710_v52 = vadd.f32 %v4630_v44, %v1709_v51  ;;  %3685 = vmatpush3.bf16.msra.mxu0 %v3808_v20  ;;  %v1913_v55 = vmax.f32 %v1707_v48, 0.0 }
 0x39a   :  { %v1916_v54 = vmax.f32 %v1718_v50, 0.0 }
 0x39b   :  { %v1914_v56 = vmax.f32 %v1710_v52, 0.0 }
 0x39c   :  { %v1970_v57 = vpack.c.bf16 %v1916_v54, %v1915_v53 }
 0x39d   :  { %v1969_v58 = vpack.c.bf16 %v1914_v56, %v1913_v55  ;;  %v3550_v59 = vpop.f32.mrb[84].mxu1 }
 0x39e   :  { %v1731_v60 = vadd.f32 %v3550_v59, %v4630_v44  ;;  %v1722_v61 = vpop.f32.mrb[85].mxu1 }
 0x39f   :  { %v1723_v62 = vadd.f32 %v4630_v44, %v1722_v61  ;;  %v3551_v63 = vpop.f32.mrb[86].mxu1  ;;  %3624 = vmatprep.mubr.bf16.mxu0 %v1969_v58 }
 0x3a0   :  { %v1734_v0 = vadd.f32 %v3551_v63, %v4630_v44  ;;  %v1725_v1 = vpop.f32.mrb[87].mxu1  ;;  %3625 = vmatmul.mubr.bf16.gmra.mrb[144].mxu0 %v1970_v57  ;;  %v1919_v3 = vmax.f32 %v1731_v60, 0.0 }
 0x3a1   :  { %v1726_v2 = vadd.f32 %v4630_v44, %v1725_v1  ;;  %v1917_v5 = vmax.f32 %v1723_v62, 0.0 }
 0x3a2   :  { %v1920_v4 = vmax.f32 %v1734_v0, 0.0 }
 0x3a3   :  { %v1918_v6 = vmax.f32 %v1726_v2, 0.0 }
 0x3a4   :  { %v1972_v7 = vpack.c.bf16 %v1920_v4, %v1919_v3 }
 0x3a5   :  { %v1971_v8 = vpack.c.bf16 %v1918_v6, %v1917_v5  ;;  %v3554_v9 = vpop.f32.mrb[88].mxu1 }
 0x3a6   :  { %v1747_v10 = vadd.f32 %v3554_v9, %v4630_v44  ;;  %v1738_v11 = vpop.f32.mrb[89].mxu1 }
 0x3a7   :  { %v1739_v12 = vadd.f32 %v4630_v44, %v1738_v11  ;;  %v3555_v13 = vpop.f32.mrb[90].mxu1  ;;  %3628 = vmatprep.mubr.bf16.mxu0 %v1971_v8 }
 0x3a8   :  { %v1750_v14 = vadd.f32 %v3555_v13, %v4630_v44  ;;  %v1741_v15 = vpop.f32.mrb[91].mxu1  ;;  %3629 = vmatmul.mubr.bf16.gmra.mrb[148].mxu0 %v1972_v7  ;;  %v1923_v17 = vmax.f32 %v1747_v10, 0.0 }
 0x3a9   :  { %v1742_v16 = vadd.f32 %v4630_v44, %v1741_v15  ;;  %v1921_v19 = vmax.f32 %v1739_v12, 0.0 }
 0x3aa   :  { %v1924_v18 = vmax.f32 %v1750_v14, 0.0 }
 0x3ab   :  { %v1922_v20 = vmax.f32 %v1742_v16, 0.0 }
 0x3ac   :  { %v1974_v21 = vpack.c.bf16 %v1924_v18, %v1923_v17 }
 0x3ad   :  { %v1973_v22 = vpack.c.bf16 %v1922_v20, %v1921_v19  ;;  %v3558_v23 = vpop.f32.mrb[92].mxu1 }
 0x3ae   :  { %v1763_v24 = vadd.f32 %v3558_v23, %v4630_v44  ;;  %v1754_v25 = vpop.f32.mrb[93].mxu1 }
 0x3af   :  { %v1755_v26 = vadd.f32 %v4630_v44, %v1754_v25  ;;  %v3559_v27 = vpop.f32.mrb[94].mxu1  ;;  %3632 = vmatprep.mubr.bf16.mxu0 %v1973_v22 }
 0x3b0   :  { %v1766_v28 = vadd.f32 %v3559_v27, %v4630_v44  ;;  %v1757_v29 = vpop.f32.mrb[95].mxu1  ;;  %3633 = vmatmul.mubr.bf16.gmra.mrb[152].mxu0 %v1974_v21  ;;  %v1927_v31 = vmax.f32 %v1763_v24, 0.0 }
 0x3b1   :  { %v1758_v30 = vadd.f32 %v4630_v44, %v1757_v29  ;;  %v1925_v33 = vmax.f32 %v1755_v26, 0.0 }
 0x3b2   :  { %v1928_v32 = vmax.f32 %v1766_v28, 0.0 }
 0x3b3   :  { %v1926_v34 = vmax.f32 %v1758_v30, 0.0 }
 0x3b4   :  { %v1976_v35 = vpack.c.bf16 %v1928_v32, %v1927_v31 }
 0x3b5   :  { %v1975_v36 = vpack.c.bf16 %v1926_v34, %v1925_v33  ;;  %v3562_v37 = vpop.f32.mrb[96].mxu1 }
 0x3b6   :  { %v1779_v38 = vadd.f32 %v3562_v37, %v4630_v44  ;;  %v1770_v39 = vpop.f32.mrb[97].mxu1  ;;  %v3809_v37 = vld [vmem:[%s5111_s1 + $0x178] sm:$0xff]  }
 0x3b7   :  { %v1771_v40 = vadd.f32 %v4630_v44, %v1770_v39  ;;  %v3563_v41 = vpop.f32.mrb[98].mxu1  ;;  %3636 = vmatprep.mubr.bf16.mxu0 %v1975_v36  ;;  %3759 = vmatprep.subr.bf16.mxu1 %v3809_v37 }
 0x3b8   :  { %v1782_v42 = vadd.f32 %v3563_v41, %v4630_v44  ;;  %v1773_v43 = vpop.f32.mrb[99].mxu1  ;;  %3637 = vmatmul.mubr.bf16.gmra.mrb[156].mxu0 %v1976_v35  ;;  %v1931_v46 = vmax.f32 %v1779_v38, 0.0  ;;  %3686 = vmatprep.subr.bf16.mxu0 %v3809_v37 }
 0x3b9   :  { %v1774_v45 = vadd.f32 %v4630_v44, %v1773_v43  ;;  %v1929_v48 = vmax.f32 %v1771_v40, 0.0  ;;  %3767 = vmatpush3.bf16.msra.mxu1 %v3809_v37  ;;  %3687 = vmatpush3.bf16.msra.mxu0 %v3809_v37 }
 0x3ba   :  { %v1932_v47 = vmax.f32 %v1782_v42, 0.0 }
 0x3bb   :  { %v1930_v49 = vmax.f32 %v1774_v45, 0.0 }
 0x3bc   :  { %v1978_v50 = vpack.c.bf16 %v1932_v47, %v1931_v46 }
 0x3bd   :  { %v1977_v51 = vpack.c.bf16 %v1930_v49, %v1929_v48  ;;  %v3566_v52 = vpop.f32.mrb[100].mxu1 }
 0x3be   :  { %v1795_v53 = vadd.f32 %v3566_v52, %v4630_v44  ;;  %v1786_v54 = vpop.f32.mrb[101].mxu1 }
 0x3bf   :  { %v1787_v55 = vadd.f32 %v4630_v44, %v1786_v54  ;;  %v3567_v56 = vpop.f32.mrb[102].mxu1  ;;  %3640 = vmatprep.mubr.bf16.mxu0 %v1977_v51 }
 0x3c0   :  { %v1798_v57 = vadd.f32 %v3567_v56, %v4630_v44  ;;  %v1789_v58 = vpop.f32.mrb[103].mxu1  ;;  %3641 = vmatmul.mubr.bf16.gmra.mrb[160].mxu0 %v1978_v50  ;;  %v1935_v60 = vmax.f32 %v1795_v53, 0.0 }
 0x3c1   :  { %v1790_v59 = vadd.f32 %v4630_v44, %v1789_v58  ;;  %v1933_v62 = vmax.f32 %v1787_v55, 0.0 }
 0x3c2   :  { %v1936_v61 = vmax.f32 %v1798_v57, 0.0 }
 0x3c3   :  { %v1934_v63 = vmax.f32 %v1790_v59, 0.0 }
 0x3c4   :  { %v1980_v0 = vpack.c.bf16 %v1936_v61, %v1935_v60 }
 0x3c5   :  { %v1979_v1 = vpack.c.bf16 %v1934_v63, %v1933_v62  ;;  %v3570_v2 = vpop.f32.mrb[104].mxu1 }
 0x3c6   :  { %v1811_v3 = vadd.f32 %v3570_v2, %v4630_v44  ;;  %v1802_v4 = vpop.f32.mrb[105].mxu1 }
 0x3c7   :  { %v1803_v5 = vadd.f32 %v4630_v44, %v1802_v4  ;;  %v3571_v6 = vpop.f32.mrb[106].mxu1  ;;  %3644 = vmatprep.mubr.bf16.mxu0 %v1979_v1 }
 0x3c8   :  { %v1814_v7 = vadd.f32 %v3571_v6, %v4630_v44  ;;  %v1805_v8 = vpop.f32.mrb[107].mxu1  ;;  %3645 = vmatmul.mubr.bf16.gmra.mrb[164].mxu0 %v1980_v0  ;;  %v1939_v10 = vmax.f32 %v1811_v3, 0.0 }
 0x3c9   :  { %v1806_v9 = vadd.f32 %v4630_v44, %v1805_v8  ;;  %v1937_v12 = vmax.f32 %v1803_v5, 0.0 }
 0x3ca   :  { %v1940_v11 = vmax.f32 %v1814_v7, 0.0 }
 0x3cb   :  { %v1938_v13 = vmax.f32 %v1806_v9, 0.0 }
 0x3cc   :  { %v1982_v14 = vpack.c.bf16 %v1940_v11, %v1939_v10 }
 0x3cd   :  { %v1981_v15 = vpack.c.bf16 %v1938_v13, %v1937_v12  ;;  %v3574_v16 = vpop.f32.mrb[108].mxu1 }
 0x3ce   :  { %v1827_v17 = vadd.f32 %v3574_v16, %v4630_v44  ;;  %v1818_v18 = vpop.f32.mrb[109].mxu1 }
 0x3cf   :  { %v1819_v19 = vadd.f32 %v4630_v44, %v1818_v18  ;;  %v3575_v20 = vpop.f32.mrb[110].mxu1  ;;  %3648 = vmatprep.mubr.bf16.mxu0 %v1981_v15 }
 0x3d0   :  { %v1830_v21 = vadd.f32 %v3575_v20, %v4630_v44  ;;  %v1821_v22 = vpop.f32.mrb[111].mxu1  ;;  %3649 = vmatmul.mubr.bf16.gmra.mrb[168].mxu0 %v1982_v14  ;;  %v1943_v24 = vmax.f32 %v1827_v17, 0.0 }
 0x3d1   :  { %v1822_v23 = vadd.f32 %v4630_v44, %v1821_v22  ;;  %v1941_v26 = vmax.f32 %v1819_v19, 0.0 }
 0x3d2   :  { %v1944_v25 = vmax.f32 %v1830_v21, 0.0 }
 0x3d3   :  { %v1942_v27 = vmax.f32 %v1822_v23, 0.0 }
 0x3d4   :  { %v1984_v28 = vpack.c.bf16 %v1944_v25, %v1943_v24  ;;  %v4720_v24 = vld [vmem:[%s5113_s2 + $0x4] ss:$0 sm:$0xff] }
 0x3d5   :  { %v1983_v29 = vpack.c.bf16 %v1942_v27, %v1941_v26  ;;  %v3578_v30 = vpop.f32.mrb[112].mxu1 }
 0x3d6   :  { %v1843_v31 = vadd.f32 %v3578_v30, %v4630_v44  ;;  %v1834_v32 = vpop.f32.mrb[113].mxu1 }
 0x3d7   :  { %v1835_v33 = vadd.f32 %v4630_v44, %v1834_v32  ;;  %v3579_v34 = vpop.f32.mrb[114].mxu1  ;;  %3652 = vmatprep.mubr.bf16.mxu0 %v1983_v29 }
 0x3d8   :  { %v1846_v35 = vadd.f32 %v3579_v34, %v4630_v44  ;;  %v1837_v36 = vpop.f32.mrb[115].mxu1  ;;  %3653 = vmatmul.mubr.bf16.gmra.mrb[172].mxu0 %v1984_v28  ;;  %v1947_v39 = vmax.f32 %v1843_v31, 0.0 }
 0x3d9   :  { %v1838_v38 = vadd.f32 %v4630_v44, %v1837_v36  ;;  %v1945_v41 = vmax.f32 %v1835_v33, 0.0 }
 0x3da   :  { %v1948_v40 = vmax.f32 %v1846_v35, 0.0 }
 0x3db   :  { %v1946_v42 = vmax.f32 %v1838_v38, 0.0 }
 0x3dc   :  { %v1986_v43 = vpack.c.bf16 %v1948_v40, %v1947_v39 }
 0x3dd   :  { %v1985_v45 = vpack.c.bf16 %v1946_v42, %v1945_v41  ;;  %v3582_v46 = vpop.f32.mrb[116].mxu1 }
 0x3de   :  { %v1859_v47 = vadd.f32 %v3582_v46, %v4630_v44  ;;  %v1850_v48 = vpop.f32.mrb[117].mxu1 }
 0x3df   :  { %v1851_v49 = vadd.f32 %v4630_v44, %v1850_v48  ;;  %v3583_v50 = vpop.f32.mrb[118].mxu1  ;;  %3656 = vmatprep.mubr.bf16.mxu0 %v1985_v45 }
 0x3e0   :  { %v1862_v51 = vadd.f32 %v3583_v50, %v4630_v44  ;;  %v1853_v52 = vpop.f32.mrb[119].mxu1  ;;  %3657 = vmatmul.mubr.bf16.gmra.mrb[176].mxu0 %v1986_v43  ;;  %v1951_v54 = vmax.f32 %v1859_v47, 0.0 }
 0x3e1   :  { %v1854_v53 = vadd.f32 %v4630_v44, %v1853_v52  ;;  %v1949_v56 = vmax.f32 %v1851_v49, 0.0 }
 0x3e2   :  { %v1952_v55 = vmax.f32 %v1862_v51, 0.0 }
 0x3e3   :  { %v1950_v57 = vmax.f32 %v1854_v53, 0.0 }
 0x3e4   :  { %v1988_v58 = vpack.c.bf16 %v1952_v55, %v1951_v54 }
 0x3e5   :  { %v1987_v59 = vpack.c.bf16 %v1950_v57, %v1949_v56  ;;  %v3586_v60 = vpop.f32.mrb[120].mxu1 }
 0x3e6   :  { %v1875_v61 = vadd.f32 %v3586_v60, %v4630_v44  ;;  %v1866_v62 = vpop.f32.mrb[121].mxu1 }
 0x3e7   :  { %v1867_v63 = vadd.f32 %v4630_v44, %v1866_v62  ;;  %v3587_v0 = vpop.f32.mrb[122].mxu1  ;;  %3660 = vmatprep.mubr.bf16.mxu0 %v1987_v59 }
 0x3e8   :  { %v1878_v1 = vadd.f32 %v3587_v0, %v4630_v44  ;;  %v1869_v2 = vpop.f32.mrb[123].mxu1  ;;  %3661 = vmatmul.mubr.bf16.gmra.mrb[180].mxu0 %v1988_v58  ;;  %v1955_v4 = vmax.f32 %v1875_v61, 0.0 }
 0x3e9   :  { %v1870_v3 = vadd.f32 %v4630_v44, %v1869_v2  ;;  %v1953_v6 = vmax.f32 %v1867_v63, 0.0 }
 0x3ea   :  { %v1956_v5 = vmax.f32 %v1878_v1, 0.0 }
 0x3eb   :  { %v1954_v7 = vmax.f32 %v1870_v3, 0.0 }
 0x3ec   :  { %v1990_v8 = vpack.c.bf16 %v1956_v5, %v1955_v4 }
 0x3ed   :  { %v1989_v9 = vpack.c.bf16 %v1954_v7, %v1953_v6  ;;  %v3590_v10 = vpop.f32.mrb[124].mxu1 }
 0x3ee   :  { %v1891_v11 = vadd.f32 %v3590_v10, %v4630_v44  ;;  %v1882_v12 = vpop.f32.mrb[125].mxu1 }
 0x3ef   :  { %v1883_v13 = vadd.f32 %v4630_v44, %v1882_v12  ;;  %v3591_v14 = vpop.f32.mrb[126].mxu1  ;;  %3664 = vmatprep.mubr.bf16.mxu0 %v1989_v9 }
 0x3f0   :  { %v1894_v15 = vadd.f32 %v3591_v14, %v4630_v44  ;;  %v1885_v16 = vpop.f32.mrb[127].mxu1  ;;  %3665 = vmatmul.mubr.bf16.gmra.mrb[184].mxu0 %v1990_v8  ;;  %v1959_v18 = vmax.f32 %v1891_v11, 0.0 }
 0x3f1   :  { %v1886_v17 = vadd.f32 %v4630_v44, %v1885_v16  ;;  %v1957_v20 = vmax.f32 %v1883_v13, 0.0 }
 0x3f2   :  { %v1960_v19 = vmax.f32 %v1894_v15, 0.0 }
 0x3f3   :  { %v1958_v21 = vmax.f32 %v1886_v17, 0.0 }
 0x3f4   :  { %v1992_v22 = vpack.c.bf16 %v1960_v19, %v1959_v18 }
 0x3f5   :  { %v1991_v23 = vpack.c.bf16 %v1958_v21, %v1957_v20 }
 0x3f7   :  { %3668 = vmatprep.mubr.bf16.mxu0 %v1991_v23 }
 0x3f8   :  { %3669 = vmatmul.mubr.bf16.gmra.mrb[188].mxu0 %v1992_v22 }
 0x453   :  { %v3610_v25 = vpop.f32.mrb[128].mxu0 }
 0x454   :  { %v2109_v26 = vadd.f32 %v3610_v25, %v4720_v24  ;;  %v2100_v27 = vpop.f32.mrb[129].mxu0 }
 0x455   :  { %v2101_v28 = vadd.f32 %v4720_v24, %v2100_v27  ;;  %v3611_v44 = vpop.f32.mrb[130].mxu0 }
 0x456   :  { %v2112_v29 = vadd.f32 %v3611_v44, %v4720_v24  ;;  %v2103_v30 = vpop.f32.mrb[131].mxu0  ;;  %v2357_v32 = vmax.f32 %v2109_v26, 0.0 }
 0x457   :  { %v2104_v31 = vadd.f32 %v4720_v24, %v2103_v30  ;;  %v2355_v34 = vmax.f32 %v2101_v28, 0.0 }
 0x458   :  { %v2358_v33 = vmax.f32 %v2112_v29, 0.0 }
 0x459   :  { %v2356_v35 = vmax.f32 %v2104_v31, 0.0 }
 0x45a   :  { %v2420_v36 = vpack.c.bf16 %v2358_v33, %v2357_v32 }
 0x45b   :  { %v2419_v37 = vpack.c.bf16 %v2356_v35, %v2355_v34  ;;  %v3614_v38 = vpop.f32.mrb[132].mxu0 }
 0x45c   :  { %v2125_v39 = vadd.f32 %v3614_v38, %v4720_v24  ;;  %v2116_v40 = vpop.f32.mrb[133].mxu0 }
 0x45d   :  { %v2117_v41 = vadd.f32 %v4720_v24, %v2116_v40  ;;  %v3615_v42 = vpop.f32.mrb[134].mxu0  ;;  %3688 = vmatprep.mubr.bf16.mxu0 %v2419_v37 }
 0x45e   :  { %v2128_v43 = vadd.f32 %v3615_v42, %v4720_v24  ;;  %v2119_v45 = vpop.f32.mrb[135].mxu0  ;;  %3689 = vmatmul.mubr.bf16.vlgmr.msra.gmra.mrb[192].mxu0 %v2420_v36  ;;  %v2361_v47 = vmax.f32 %v2125_v39, 0.0 }
 0x45f   :  { %v2120_v46 = vadd.f32 %v4720_v24, %v2119_v45  ;;  %v2359_v49 = vmax.f32 %v2117_v41, 0.0 }
 0x460   :  { %v2362_v48 = vmax.f32 %v2128_v43, 0.0 }
 0x461   :  { %v2360_v50 = vmax.f32 %v2120_v46, 0.0 }
 0x462   :  { %v2422_v51 = vpack.c.bf16 %v2362_v48, %v2361_v47 }
 0x463   :  { %v2421_v52 = vpack.c.bf16 %v2360_v50, %v2359_v49  ;;  %v3618_v53 = vpop.f32.mrb[136].mxu0 }
 0x464   :  { %v2141_v54 = vadd.f32 %v3618_v53, %v4720_v24  ;;  %v2132_v55 = vpop.f32.mrb[137].mxu0 }
 0x465   :  { %v2133_v56 = vadd.f32 %v4720_v24, %v2132_v55  ;;  %v3619_v57 = vpop.f32.mrb[138].mxu0  ;;  %3692 = vmatprep.mubr.bf16.mxu1 %v2421_v52 }
 0x466   :  { %v2144_v58 = vadd.f32 %v3619_v57, %v4720_v24  ;;  %v2135_v59 = vpop.f32.mrb[139].mxu0  ;;  %3693 = vmatmul.mubr.bf16.vlgmr.msra.gmra.mrb[128].mxu1 %v2422_v51  ;;  %v2365_v61 = vmax.f32 %v2141_v54, 0.0 }
 0x467   :  { %v2136_v60 = vadd.f32 %v4720_v24, %v2135_v59  ;;  %v2363_v63 = vmax.f32 %v2133_v56, 0.0 }
 0x468   :  { %v2366_v62 = vmax.f32 %v2144_v58, 0.0 }
 0x469   :  { %v2364_v0 = vmax.f32 %v2136_v60, 0.0 }
 0x46a   :  { %v2424_v1 = vpack.c.bf16 %v2366_v62, %v2365_v61 }
 0x46b   :  { %v2423_v2 = vpack.c.bf16 %v2364_v0, %v2363_v63  ;;  %v3622_v3 = vpop.f32.mrb[140].mxu0 }
 0x46c   :  { %v2157_v4 = vadd.f32 %v3622_v3, %v4720_v24  ;;  %v2148_v5 = vpop.f32.mrb[141].mxu0 }
 0x46d   :  { %v2149_v6 = vadd.f32 %v4720_v24, %v2148_v5  ;;  %v3623_v7 = vpop.f32.mrb[142].mxu0  ;;  %3696 = vmatprep.mubr.bf16.mxu1 %v2423_v2 }
 0x46e   :  { %v2160_v8 = vadd.f32 %v3623_v7, %v4720_v24  ;;  %v2151_v9 = vpop.f32.mrb[143].mxu0  ;;  %3697 = vmatmul.mubr.bf16.gmra.mrb[132].mxu1 %v2424_v1  ;;  %v2369_v11 = vmax.f32 %v2157_v4, 0.0 }
 0x46f   :  { %v2152_v10 = vadd.f32 %v4720_v24, %v2151_v9  ;;  %v2367_v13 = vmax.f32 %v2149_v6, 0.0 }
 0x470   :  { %v2370_v12 = vmax.f32 %v2160_v8, 0.0 }
 0x471   :  { %v2368_v14 = vmax.f32 %v2152_v10, 0.0 }
 0x472   :  { %v2426_v15 = vpack.c.bf16 %v2370_v12, %v2369_v11 }
 0x473   :  { %v2425_v16 = vpack.c.bf16 %v2368_v14, %v2367_v13  ;;  %v3626_v17 = vpop.f32.mrb[144].mxu0 }
 0x474   :  { %v2173_v18 = vadd.f32 %v3626_v17, %v4720_v24  ;;  %v2164_v19 = vpop.f32.mrb[145].mxu0 }
 0x475   :  { %v2165_v20 = vadd.f32 %v4720_v24, %v2164_v19  ;;  %v3627_v21 = vpop.f32.mrb[146].mxu0  ;;  %3700 = vmatprep.mubr.bf16.mxu1 %v2425_v16 }
 0x476   :  { %v2176_v22 = vadd.f32 %v3627_v21, %v4720_v24  ;;  %v2167_v23 = vpop.f32.mrb[147].mxu0  ;;  %3701 = vmatmul.mubr.bf16.gmra.mrb[136].mxu1 %v2426_v15  ;;  %v2373_v26 = vmax.f32 %v2173_v18, 0.0 }
 0x477   :  { %v2168_v25 = vadd.f32 %v4720_v24, %v2167_v23  ;;  %v2371_v28 = vmax.f32 %v2165_v20, 0.0 }
 0x478   :  { %v2374_v27 = vmax.f32 %v2176_v22, 0.0 }
 0x479   :  { %v2372_v44 = vmax.f32 %v2168_v25, 0.0 }
 0x47a   :  { %v2428_v29 = vpack.c.bf16 %v2374_v27, %v2373_v26 }
 0x47b   :  { %v2427_v30 = vpack.c.bf16 %v2372_v44, %v2371_v28  ;;  %v3630_v31 = vpop.f32.mrb[148].mxu0 }
 0x47c   :  { %v2189_v32 = vadd.f32 %v3630_v31, %v4720_v24  ;;  %v2180_v33 = vpop.f32.mrb[149].mxu0 }
 0x47d   :  { %v2181_v34 = vadd.f32 %v4720_v24, %v2180_v33  ;;  %v3631_v35 = vpop.f32.mrb[150].mxu0  ;;  %3704 = vmatprep.mubr.bf16.mxu1 %v2427_v30 }
 0x47e   :  { %v2192_v36 = vadd.f32 %v3631_v35, %v4720_v24  ;;  %v2183_v37 = vpop.f32.mrb[151].mxu0  ;;  %3705 = vmatmul.mubr.bf16.gmra.mrb[140].mxu1 %v2428_v29  ;;  %v2377_v39 = vmax.f32 %v2189_v32, 0.0 }
 0x47f   :  { %v2184_v38 = vadd.f32 %v4720_v24, %v2183_v37  ;;  %v2375_v41 = vmax.f32 %v2181_v34, 0.0 }
 0x480   :  { %v2378_v40 = vmax.f32 %v2192_v36, 0.0 }
 0x481   :  { %v2376_v42 = vmax.f32 %v2184_v38, 0.0 }
 0x482   :  { %v2430_v43 = vpack.c.bf16 %v2378_v40, %v2377_v39 }
 0x483   :  { %v2429_v45 = vpack.c.bf16 %v2376_v42, %v2375_v41  ;;  %v3634_v46 = vpop.f32.mrb[152].mxu0 }
 0x484   :  { %v2205_v47 = vadd.f32 %v3634_v46, %v4720_v24  ;;  %v2196_v48 = vpop.f32.mrb[153].mxu0 }
 0x485   :  { %v2197_v49 = vadd.f32 %v4720_v24, %v2196_v48  ;;  %v3635_v50 = vpop.f32.mrb[154].mxu0  ;;  %3708 = vmatprep.mubr.bf16.mxu1 %v2429_v45 }
 0x486   :  { %v2208_v51 = vadd.f32 %v3635_v50, %v4720_v24  ;;  %v2199_v52 = vpop.f32.mrb[155].mxu0  ;;  %3709 = vmatmul.mubr.bf16.gmra.mrb[144].mxu1 %v2430_v43  ;;  %v2381_v54 = vmax.f32 %v2205_v47, 0.0 }
 0x487   :  { %v2200_v53 = vadd.f32 %v4720_v24, %v2199_v52  ;;  %v2379_v56 = vmax.f32 %v2197_v49, 0.0 }
 0x488   :  { %v2382_v55 = vmax.f32 %v2208_v51, 0.0 }
 0x489   :  { %v2380_v57 = vmax.f32 %v2200_v53, 0.0 }
 0x48a   :  { %v2432_v58 = vpack.c.bf16 %v2382_v55, %v2381_v54 }
 0x48b   :  { %v2431_v59 = vpack.c.bf16 %v2380_v57, %v2379_v56  ;;  %v3638_v60 = vpop.f32.mrb[156].mxu0 }
 0x48c   :  { %v2221_v61 = vadd.f32 %v3638_v60, %v4720_v24  ;;  %v2212_v62 = vpop.f32.mrb[157].mxu0 }
 0x48d   :  { %v2213_v63 = vadd.f32 %v4720_v24, %v2212_v62  ;;  %v3639_v0 = vpop.f32.mrb[158].mxu0  ;;  %3712 = vmatprep.mubr.bf16.mxu1 %v2431_v59 }
 0x48e   :  { %v2224_v1 = vadd.f32 %v3639_v0, %v4720_v24  ;;  %v2215_v2 = vpop.f32.mrb[159].mxu0  ;;  %3713 = vmatmul.mubr.bf16.gmra.mrb[148].mxu1 %v2432_v58  ;;  %v2385_v4 = vmax.f32 %v2221_v61, 0.0 }
 0x48f   :  { %v2216_v3 = vadd.f32 %v4720_v24, %v2215_v2  ;;  %v2383_v6 = vmax.f32 %v2213_v63, 0.0 }
 0x490   :  { %v2386_v5 = vmax.f32 %v2224_v1, 0.0 }
 0x491   :  { %v2384_v7 = vmax.f32 %v2216_v3, 0.0 }
 0x492   :  { %v2434_v8 = vpack.c.bf16 %v2386_v5, %v2385_v4 }
 0x493   :  { %v2433_v9 = vpack.c.bf16 %v2384_v7, %v2383_v6  ;;  %v3642_v10 = vpop.f32.mrb[160].mxu0 }
 0x494   :  { %v2237_v11 = vadd.f32 %v3642_v10, %v4720_v24  ;;  %v2228_v12 = vpop.f32.mrb[161].mxu0 }
 0x495   :  { %v2229_v13 = vadd.f32 %v4720_v24, %v2228_v12  ;;  %v3643_v14 = vpop.f32.mrb[162].mxu0  ;;  %3716 = vmatprep.mubr.bf16.mxu1 %v2433_v9 }
 0x496   :  { %v2240_v15 = vadd.f32 %v3643_v14, %v4720_v24  ;;  %v2231_v16 = vpop.f32.mrb[163].mxu0  ;;  %3717 = vmatmul.mubr.bf16.gmra.mrb[152].mxu1 %v2434_v8  ;;  %v2389_v18 = vmax.f32 %v2237_v11, 0.0 }
 0x497   :  { %v2232_v17 = vadd.f32 %v4720_v24, %v2231_v16  ;;  %v2387_v20 = vmax.f32 %v2229_v13, 0.0 }
 0x498   :  { %v2390_v19 = vmax.f32 %v2240_v15, 0.0 }
 0x499   :  { %v2388_v21 = vmax.f32 %v2232_v17, 0.0 }
 0x49a   :  { %v2436_v22 = vpack.c.bf16 %v2390_v19, %v2389_v18 }
 0x49b   :  { %v2435_v23 = vpack.c.bf16 %v2388_v21, %v2387_v20  ;;  %v3646_v25 = vpop.f32.mrb[164].mxu0 }
 0x49c   :  { %v2253_v26 = vadd.f32 %v3646_v25, %v4720_v24  ;;  %v2244_v27 = vpop.f32.mrb[165].mxu0 }
 0x49d   :  { %v2245_v28 = vadd.f32 %v4720_v24, %v2244_v27  ;;  %v3647_v44 = vpop.f32.mrb[166].mxu0  ;;  %3720 = vmatprep.mubr.bf16.mxu1 %v2435_v23 }
 0x49e   :  { %v2256_v29 = vadd.f32 %v3647_v44, %v4720_v24  ;;  %v2247_v30 = vpop.f32.mrb[167].mxu0  ;;  %3721 = vmatmul.mubr.bf16.gmra.mrb[156].mxu1 %v2436_v22  ;;  %v2393_v32 = vmax.f32 %v2253_v26, 0.0 }
 0x49f   :  { %v2248_v31 = vadd.f32 %v4720_v24, %v2247_v30  ;;  %v2391_v34 = vmax.f32 %v2245_v28, 0.0 }
 0x4a0   :  { %v2394_v33 = vmax.f32 %v2256_v29, 0.0 }
 0x4a1   :  { %v2392_v35 = vmax.f32 %v2248_v31, 0.0 }
 0x4a2   :  { %v2438_v36 = vpack.c.bf16 %v2394_v33, %v2393_v32 }
 0x4a3   :  { %v2437_v37 = vpack.c.bf16 %v2392_v35, %v2391_v34  ;;  %v3650_v38 = vpop.f32.mrb[168].mxu0 }
 0x4a4   :  { %v2269_v39 = vadd.f32 %v3650_v38, %v4720_v24  ;;  %v2260_v40 = vpop.f32.mrb[169].mxu0 }
 0x4a5   :  { %v2261_v41 = vadd.f32 %v4720_v24, %v2260_v40  ;;  %v3651_v42 = vpop.f32.mrb[170].mxu0  ;;  %3724 = vmatprep.mubr.bf16.mxu1 %v2437_v37 }
 0x4a6   :  { %v2272_v43 = vadd.f32 %v3651_v42, %v4720_v24  ;;  %v2263_v45 = vpop.f32.mrb[171].mxu0  ;;  %3725 = vmatmul.mubr.bf16.gmra.mrb[160].mxu1 %v2438_v36  ;;  %v2397_v47 = vmax.f32 %v2269_v39, 0.0 }
 0x4a7   :  { %v2264_v46 = vadd.f32 %v4720_v24, %v2263_v45  ;;  %v2395_v49 = vmax.f32 %v2261_v41, 0.0 }
 0x4a8   :  { %v2398_v48 = vmax.f32 %v2272_v43, 0.0 }
 0x4a9   :  { %v2396_v50 = vmax.f32 %v2264_v46, 0.0 }
 0x4aa   :  { %v2440_v51 = vpack.c.bf16 %v2398_v48, %v2397_v47 }
 0x4ab   :  { %v2439_v52 = vpack.c.bf16 %v2396_v50, %v2395_v49  ;;  %v3654_v53 = vpop.f32.mrb[172].mxu0 }
 0x4ac   :  { %v2285_v54 = vadd.f32 %v3654_v53, %v4720_v24  ;;  %v2276_v55 = vpop.f32.mrb[173].mxu0 }
 0x4ad   :  { %v2277_v56 = vadd.f32 %v4720_v24, %v2276_v55  ;;  %v3655_v57 = vpop.f32.mrb[174].mxu0  ;;  %3728 = vmatprep.mubr.bf16.mxu1 %v2439_v52 }
 0x4ae   :  { %v2288_v58 = vadd.f32 %v3655_v57, %v4720_v24  ;;  %v2279_v59 = vpop.f32.mrb[175].mxu0  ;;  %3729 = vmatmul.mubr.bf16.gmra.mrb[164].mxu1 %v2440_v51  ;;  %v2401_v61 = vmax.f32 %v2285_v54, 0.0 }
 0x4af   :  { %v2280_v60 = vadd.f32 %v4720_v24, %v2279_v59  ;;  %v2399_v63 = vmax.f32 %v2277_v56, 0.0 }
 0x4b0   :  { %v2402_v62 = vmax.f32 %v2288_v58, 0.0 }
 0x4b1   :  { %v2400_v0 = vmax.f32 %v2280_v60, 0.0  ;;  %v4789_v60 = vld [vmem:[%s5113_s2 + $0x5] ss:$0 sm:$0xff] }
 0x4b2   :  { %v2442_v1 = vpack.c.bf16 %v2402_v62, %v2401_v61 }
 0x4b3   :  { %v2441_v2 = vpack.c.bf16 %v2400_v0, %v2399_v63  ;;  %v3658_v3 = vpop.f32.mrb[176].mxu0 }
 0x4b4   :  { %v2301_v4 = vadd.f32 %v3658_v3, %v4720_v24  ;;  %v2292_v5 = vpop.f32.mrb[177].mxu0 }
 0x4b5   :  { %v2293_v6 = vadd.f32 %v4720_v24, %v2292_v5  ;;  %v3659_v7 = vpop.f32.mrb[178].mxu0  ;;  %3732 = vmatprep.mubr.bf16.mxu1 %v2441_v2 }
 0x4b6   :  { %v2304_v8 = vadd.f32 %v3659_v7, %v4720_v24  ;;  %v2295_v9 = vpop.f32.mrb[179].mxu0  ;;  %3733 = vmatmul.mubr.bf16.gmra.mrb[168].mxu1 %v2442_v1  ;;  %v2405_v11 = vmax.f32 %v2301_v4, 0.0 }
 0x4b7   :  { %v2296_v10 = vadd.f32 %v4720_v24, %v2295_v9  ;;  %v2403_v13 = vmax.f32 %v2293_v6, 0.0 }
 0x4b8   :  { %v2406_v12 = vmax.f32 %v2304_v8, 0.0 }
 0x4b9   :  { %v2404_v14 = vmax.f32 %v2296_v10, 0.0 }
 0x4ba   :  { %v2444_v15 = vpack.c.bf16 %v2406_v12, %v2405_v11 }
 0x4bb   :  { %v2443_v16 = vpack.c.bf16 %v2404_v14, %v2403_v13  ;;  %v3662_v17 = vpop.f32.mrb[180].mxu0 }
 0x4bc   :  { %v2317_v18 = vadd.f32 %v3662_v17, %v4720_v24  ;;  %v2308_v19 = vpop.f32.mrb[181].mxu0 }
 0x4bd   :  { %v2309_v20 = vadd.f32 %v4720_v24, %v2308_v19  ;;  %v3663_v21 = vpop.f32.mrb[182].mxu0  ;;  %3736 = vmatprep.mubr.bf16.mxu1 %v2443_v16 }
 0x4be   :  { %v2320_v22 = vadd.f32 %v3663_v21, %v4720_v24  ;;  %v2311_v23 = vpop.f32.mrb[183].mxu0  ;;  %3737 = vmatmul.mubr.bf16.gmra.mrb[172].mxu1 %v2444_v15  ;;  %v2409_v26 = vmax.f32 %v2317_v18, 0.0 }
 0x4bf   :  { %v2312_v25 = vadd.f32 %v4720_v24, %v2311_v23  ;;  %v2407_v28 = vmax.f32 %v2309_v20, 0.0 }
 0x4c0   :  { %v2410_v27 = vmax.f32 %v2320_v22, 0.0 }
 0x4c1   :  { %v2408_v44 = vmax.f32 %v2312_v25, 0.0 }
 0x4c2   :  { %v2446_v29 = vpack.c.bf16 %v2410_v27, %v2409_v26 }
 0x4c3   :  { %v2445_v30 = vpack.c.bf16 %v2408_v44, %v2407_v28  ;;  %v3666_v31 = vpop.f32.mrb[184].mxu0 }
 0x4c4   :  { %v2333_v32 = vadd.f32 %v3666_v31, %v4720_v24  ;;  %v2324_v33 = vpop.f32.mrb[185].mxu0 }
 0x4c5   :  { %v2325_v34 = vadd.f32 %v4720_v24, %v2324_v33  ;;  %v3667_v35 = vpop.f32.mrb[186].mxu0  ;;  %3740 = vmatprep.mubr.bf16.mxu1 %v2445_v30 }
 0x4c6   :  { %v2336_v36 = vadd.f32 %v3667_v35, %v4720_v24  ;;  %v2327_v37 = vpop.f32.mrb[187].mxu0  ;;  %3741 = vmatmul.mubr.bf16.gmra.mrb[176].mxu1 %v2446_v29  ;;  %v2413_v39 = vmax.f32 %v2333_v32, 0.0 }
 0x4c7   :  { %v2328_v38 = vadd.f32 %v4720_v24, %v2327_v37  ;;  %v2411_v41 = vmax.f32 %v2325_v34, 0.0 }
 0x4c8   :  { %v2414_v40 = vmax.f32 %v2336_v36, 0.0 }
 0x4c9   :  { %v2412_v42 = vmax.f32 %v2328_v38, 0.0 }
 0x4ca   :  { %v2448_v43 = vpack.c.bf16 %v2414_v40, %v2413_v39 }
 0x4cb   :  { %v2447_v45 = vpack.c.bf16 %v2412_v42, %v2411_v41  ;;  %v3670_v46 = vpop.f32.mrb[188].mxu0 }
 0x4cc   :  { %v2349_v47 = vadd.f32 %v3670_v46, %v4720_v24  ;;  %v2340_v48 = vpop.f32.mrb[189].mxu0 }
 0x4cd   :  { %v2341_v49 = vadd.f32 %v4720_v24, %v2340_v48  ;;  %v3671_v50 = vpop.f32.mrb[190].mxu0  ;;  %3744 = vmatprep.mubr.bf16.mxu1 %v2447_v45 }
 0x4ce   :  { %v2352_v51 = vadd.f32 %v3671_v50, %v4720_v24  ;;  %v2343_v52 = vpop.f32.mrb[191].mxu0  ;;  %3745 = vmatmul.mubr.bf16.gmra.mrb[180].mxu1 %v2448_v43  ;;  %v2417_v54 = vmax.f32 %v2349_v47, 0.0 }
 0x4cf   :  { %v2344_v53 = vadd.f32 %v4720_v24, %v2343_v52  ;;  %v2415_v56 = vmax.f32 %v2341_v49, 0.0 }
 0x4d0   :  { %v2418_v55 = vmax.f32 %v2352_v51, 0.0 }
 0x4d1   :  { %v2416_v57 = vmax.f32 %v2344_v53, 0.0 }
 0x4d2   :  { %v2450_v58 = vpack.c.bf16 %v2418_v55, %v2417_v54 }
 0x4d3   :  { %v2449_v59 = vpack.c.bf16 %v2416_v57, %v2415_v56 }
 0x4d5   :  { %3748 = vmatprep.mubr.bf16.mxu1 %v2449_v59 }
 0x4d6   :  { %3749 = vmatmul.mubr.bf16.gmra.mrb[184].mxu1 %v2450_v58 }
 0x531   :  { %v3690_v61 = vpop.f32.mrb[192].mxu0 }
 0x532   :  { %v2567_v62 = vadd.f32 %v3690_v61, %v4789_v60  ;;  %v2558_v63 = vpop.f32.mrb[193].mxu0 }
 0x533   :  { %v2559_v0 = vadd.f32 %v4789_v60, %v2558_v63  ;;  %v3691_v24 = vpop.f32.mrb[194].mxu0 }
 0x534   :  { %2815 = vst.msk [vmem:[%s5115_s4 + $0x10] sm:$0xff] %vm136_vm0, %v2567_v62  ;;  %v2570_v1 = vadd.f32 %v3691_v24, %v4789_v60  ;;  %v2561_v2 = vpop.f32.mrb[195].mxu0 }
 0x535   :  { %2813 = vst.msk [vmem:[%s5115_s4] sm:$0xff] %vm136_vm0, %v2559_v0  ;;  %v2562_v3 = vadd.f32 %v4789_v60, %v2561_v2 }
 0x536   :  { %2816 = vst.msk [vmem:[%s5115_s4 + $0x18] sm:$0xff] %vm136_vm0, %v2570_v1 }
 0x537   :  { %2814 = vst.msk [vmem:[%s5115_s4 + $0x8] sm:$0xff] %vm136_vm0, %v2562_v3 }
 0x539   :  { %v3694_v4 = vpop.f32.mrb[128].mxu1 }
 0x53a   :  { %v2583_v5 = vadd.f32 %v3694_v4, %v4789_v60  ;;  %v2574_v6 = vpop.f32.mrb[129].mxu1 }
 0x53b   :  { %v2575_v7 = vadd.f32 %v4789_v60, %v2574_v6  ;;  %v3695_v8 = vpop.f32.mrb[130].mxu1 }
 0x53c   :  { %2819 = vst.msk [vmem:[%s5115_s4 + $0x30] sm:$0xff] %vm136_vm0, %v2583_v5  ;;  %v2586_v9 = vadd.f32 %v3695_v8, %v4789_v60  ;;  %v2577_v10 = vpop.f32.mrb[131].mxu1 }
 0x53d   :  { %2817 = vst.msk [vmem:[%s5115_s4 + $0x20] sm:$0xff] %vm136_vm0, %v2575_v7  ;;  %v2578_v11 = vadd.f32 %v4789_v60, %v2577_v10 }
 0x53e   :  { %2820 = vst.msk [vmem:[%s5115_s4 + $0x38] sm:$0xff] %vm136_vm0, %v2586_v9 }
 0x53f   :  { %2818 = vst.msk [vmem:[%s5115_s4 + $0x28] sm:$0xff] %vm136_vm0, %v2578_v11 }
 0x541   :  { %v3698_v12 = vpop.f32.mrb[132].mxu1 }
 0x542   :  { %v2599_v13 = vadd.f32 %v3698_v12, %v4789_v60  ;;  %v2590_v14 = vpop.f32.mrb[133].mxu1 }
 0x543   :  { %v2591_v15 = vadd.f32 %v4789_v60, %v2590_v14  ;;  %v3699_v16 = vpop.f32.mrb[134].mxu1 }
 0x544   :  { %2823 = vst.msk [vmem:[%s5115_s4 + $0x50] sm:$0xff] %vm136_vm0, %v2599_v13  ;;  %v2602_v17 = vadd.f32 %v3699_v16, %v4789_v60  ;;  %v2593_v18 = vpop.f32.mrb[135].mxu1 }
 0x545   :  { %2821 = vst.msk [vmem:[%s5115_s4 + $0x40] sm:$0xff] %vm136_vm0, %v2591_v15  ;;  %v2594_v19 = vadd.f32 %v4789_v60, %v2593_v18 }
 0x546   :  { %2824 = vst.msk [vmem:[%s5115_s4 + $0x58] sm:$0xff] %vm136_vm0, %v2602_v17 }
 0x547   :  { %2822 = vst.msk [vmem:[%s5115_s4 + $0x48] sm:$0xff] %vm136_vm0, %v2594_v19 }
 0x549   :  { %v3702_v20 = vpop.f32.mrb[136].mxu1 }
 0x54a   :  { %v2615_v21 = vadd.f32 %v3702_v20, %v4789_v60  ;;  %v2606_v22 = vpop.f32.mrb[137].mxu1 }
 0x54b   :  { %v2607_v23 = vadd.f32 %v4789_v60, %v2606_v22  ;;  %v3703_v25 = vpop.f32.mrb[138].mxu1 }
 0x54c   :  { %2827 = vst.msk [vmem:[%s5115_s4 + $0x70] sm:$0xff] %vm136_vm0, %v2615_v21  ;;  %v2618_v26 = vadd.f32 %v3703_v25, %v4789_v60  ;;  %v2609_v27 = vpop.f32.mrb[139].mxu1 }
 0x54d   :  { %2825 = vst.msk [vmem:[%s5115_s4 + $0x60] sm:$0xff] %vm136_vm0, %v2607_v23  ;;  %v2610_v28 = vadd.f32 %v4789_v60, %v2609_v27 }
 0x54e   :  { %2828 = vst.msk [vmem:[%s5115_s4 + $0x78] sm:$0xff] %vm136_vm0, %v2618_v26 }
 0x54f   :  { %2826 = vst.msk [vmem:[%s5115_s4 + $0x68] sm:$0xff] %vm136_vm0, %v2610_v28 }
 0x551   :  { %v3706_v44 = vpop.f32.mrb[140].mxu1 }
 0x552   :  { %v2631_v29 = vadd.f32 %v3706_v44, %v4789_v60  ;;  %v2622_v30 = vpop.f32.mrb[141].mxu1 }
 0x553   :  { %v2623_v31 = vadd.f32 %v4789_v60, %v2622_v30  ;;  %v3707_v32 = vpop.f32.mrb[142].mxu1 }
 0x554   :  { %2831 = vst.msk [vmem:[%s5115_s4 + $0x90] sm:$0xff] %vm136_vm0, %v2631_v29  ;;  %v2634_v33 = vadd.f32 %v3707_v32, %v4789_v60  ;;  %v2625_v34 = vpop.f32.mrb[143].mxu1 }
 0x555   :  { %2829 = vst.msk [vmem:[%s5115_s4 + $0x80] sm:$0xff] %vm136_vm0, %v2623_v31  ;;  %v2626_v35 = vadd.f32 %v4789_v60, %v2625_v34 }
 0x556   :  { %2832 = vst.msk [vmem:[%s5115_s4 + $0x98] sm:$0xff] %vm136_vm0, %v2634_v33 }
 0x557   :  { %2830 = vst.msk [vmem:[%s5115_s4 + $0x88] sm:$0xff] %vm136_vm0, %v2626_v35 }
 0x559   :  { %v3710_v36 = vpop.f32.mrb[144].mxu1 }
 0x55a   :  { %v2647_v37 = vadd.f32 %v3710_v36, %v4789_v60  ;;  %v2638_v38 = vpop.f32.mrb[145].mxu1 }
 0x55b   :  { %v2639_v39 = vadd.f32 %v4789_v60, %v2638_v38  ;;  %v3711_v40 = vpop.f32.mrb[146].mxu1 }
 0x55c   :  { %2835 = vst.msk [vmem:[%s5115_s4 + $0xb0] sm:$0xff] %vm136_vm0, %v2647_v37  ;;  %v2650_v41 = vadd.f32 %v3711_v40, %v4789_v60  ;;  %v2641_v42 = vpop.f32.mrb[147].mxu1 }
 0x55d   :  { %2833 = vst.msk [vmem:[%s5115_s4 + $0xa0] sm:$0xff] %vm136_vm0, %v2639_v39  ;;  %v2642_v43 = vadd.f32 %v4789_v60, %v2641_v42 }
 0x55e   :  { %2836 = vst.msk [vmem:[%s5115_s4 + $0xb8] sm:$0xff] %vm136_vm0, %v2650_v41 }
 0x55f   :  { %2834 = vst.msk [vmem:[%s5115_s4 + $0xa8] sm:$0xff] %vm136_vm0, %v2642_v43 }
 0x561   :  { %v3714_v45 = vpop.f32.mrb[148].mxu1 }
 0x562   :  { %v2663_v46 = vadd.f32 %v3714_v45, %v4789_v60  ;;  %v2654_v47 = vpop.f32.mrb[149].mxu1 }
 0x563   :  { %v2655_v48 = vadd.f32 %v4789_v60, %v2654_v47  ;;  %v3715_v49 = vpop.f32.mrb[150].mxu1 }
 0x564   :  { %2839 = vst.msk [vmem:[%s5115_s4 + $0xd0] sm:$0xff] %vm136_vm0, %v2663_v46  ;;  %v2666_v50 = vadd.f32 %v3715_v49, %v4789_v60  ;;  %v2657_v51 = vpop.f32.mrb[151].mxu1 }
 0x565   :  { %2837 = vst.msk [vmem:[%s5115_s4 + $0xc0] sm:$0xff] %vm136_vm0, %v2655_v48  ;;  %v2658_v52 = vadd.f32 %v4789_v60, %v2657_v51 }
 0x566   :  { %2840 = vst.msk [vmem:[%s5115_s4 + $0xd8] sm:$0xff] %vm136_vm0, %v2666_v50 }
 0x567   :  { %2838 = vst.msk [vmem:[%s5115_s4 + $0xc8] sm:$0xff] %vm136_vm0, %v2658_v52 }
 0x569   :  { %v3718_v53 = vpop.f32.mrb[152].mxu1 }
 0x56a   :  { %v2679_v54 = vadd.f32 %v3718_v53, %v4789_v60  ;;  %v2670_v55 = vpop.f32.mrb[153].mxu1 }
 0x56b   :  { %v2671_v56 = vadd.f32 %v4789_v60, %v2670_v55  ;;  %v3719_v57 = vpop.f32.mrb[154].mxu1 }
 0x56c   :  { %2843 = vst.msk [vmem:[%s5115_s4 + $0xf0] sm:$0xff] %vm136_vm0, %v2679_v54  ;;  %v2682_v58 = vadd.f32 %v3719_v57, %v4789_v60  ;;  %v2673_v59 = vpop.f32.mrb[155].mxu1 }
 0x56d   :  { %2841 = vst.msk [vmem:[%s5115_s4 + $0xe0] sm:$0xff] %vm136_vm0, %v2671_v56  ;;  %v2674_v61 = vadd.f32 %v4789_v60, %v2673_v59 }
 0x56e   :  { %2844 = vst.msk [vmem:[%s5115_s4 + $0xf8] sm:$0xff] %vm136_vm0, %v2682_v58 }
 0x56f   :  { %2842 = vst.msk [vmem:[%s5115_s4 + $0xe8] sm:$0xff] %vm136_vm0, %v2674_v61 }
 0x571   :  { %v3722_v62 = vpop.f32.mrb[156].mxu1 }
 0x572   :  { %v2695_v63 = vadd.f32 %v3722_v62, %v4789_v60  ;;  %v2686_v0 = vpop.f32.mrb[157].mxu1 }
 0x573   :  { %v2687_v24 = vadd.f32 %v4789_v60, %v2686_v0  ;;  %v3723_v1 = vpop.f32.mrb[158].mxu1 }
 0x574   :  { %2847 = vst.msk [vmem:[%s5115_s4 + $0x110] sm:$0xff] %vm136_vm0, %v2695_v63  ;;  %v2698_v2 = vadd.f32 %v3723_v1, %v4789_v60  ;;  %v2689_v3 = vpop.f32.mrb[159].mxu1 }
 0x575   :  { %2845 = vst.msk [vmem:[%s5115_s4 + $0x100] sm:$0xff] %vm136_vm0, %v2687_v24  ;;  %v2690_v4 = vadd.f32 %v4789_v60, %v2689_v3 }
 0x576   :  { %2848 = vst.msk [vmem:[%s5115_s4 + $0x118] sm:$0xff] %vm136_vm0, %v2698_v2 }
 0x577   :  { %2846 = vst.msk [vmem:[%s5115_s4 + $0x108] sm:$0xff] %vm136_vm0, %v2690_v4 }
 0x579   :  { %v3726_v5 = vpop.f32.mrb[160].mxu1 }
 0x57a   :  { %v2711_v6 = vadd.f32 %v3726_v5, %v4789_v60  ;;  %v2702_v7 = vpop.f32.mrb[161].mxu1 }
 0x57b   :  { %v2703_v8 = vadd.f32 %v4789_v60, %v2702_v7  ;;  %v3727_v9 = vpop.f32.mrb[162].mxu1 }
 0x57c   :  { %2851 = vst.msk [vmem:[%s5115_s4 + $0x130] sm:$0xff] %vm136_vm0, %v2711_v6  ;;  %v2714_v10 = vadd.f32 %v3727_v9, %v4789_v60  ;;  %v2705_v11 = vpop.f32.mrb[163].mxu1 }
 0x57d   :  { %2849 = vst.msk [vmem:[%s5115_s4 + $0x120] sm:$0xff] %vm136_vm0, %v2703_v8  ;;  %v2706_v12 = vadd.f32 %v4789_v60, %v2705_v11 }
 0x57e   :  { %2852 = vst.msk [vmem:[%s5115_s4 + $0x138] sm:$0xff] %vm136_vm0, %v2714_v10 }
 0x57f   :  { %2850 = vst.msk [vmem:[%s5115_s4 + $0x128] sm:$0xff] %vm136_vm0, %v2706_v12 }
 0x581   :  { %v3730_v13 = vpop.f32.mrb[164].mxu1 }
 0x582   :  { %v2727_v14 = vadd.f32 %v3730_v13, %v4789_v60  ;;  %v2718_v15 = vpop.f32.mrb[165].mxu1 }
 0x583   :  { %v2719_v16 = vadd.f32 %v4789_v60, %v2718_v15  ;;  %v3731_v17 = vpop.f32.mrb[166].mxu1 }
 0x584   :  { %2855 = vst.msk [vmem:[%s5115_s4 + $0x150] sm:$0xff] %vm136_vm0, %v2727_v14  ;;  %v2730_v18 = vadd.f32 %v3731_v17, %v4789_v60  ;;  %v2721_v19 = vpop.f32.mrb[167].mxu1 }
 0x585   :  { %2853 = vst.msk [vmem:[%s5115_s4 + $0x140] sm:$0xff] %vm136_vm0, %v2719_v16  ;;  %v2722_v20 = vadd.f32 %v4789_v60, %v2721_v19 }
 0x586   :  { %2856 = vst.msk [vmem:[%s5115_s4 + $0x158] sm:$0xff] %vm136_vm0, %v2730_v18 }
 0x587   :  { %2854 = vst.msk [vmem:[%s5115_s4 + $0x148] sm:$0xff] %vm136_vm0, %v2722_v20 }
 0x589   :  { %v3734_v21 = vpop.f32.mrb[168].mxu1 }
 0x58a   :  { %v2743_v22 = vadd.f32 %v3734_v21, %v4789_v60  ;;  %v2734_v23 = vpop.f32.mrb[169].mxu1 }
 0x58b   :  { %v2735_v25 = vadd.f32 %v4789_v60, %v2734_v23  ;;  %v3735_v26 = vpop.f32.mrb[170].mxu1 }
 0x58c   :  { %2859 = vst.msk [vmem:[%s5115_s4 + $0x170] sm:$0xff] %vm136_vm0, %v2743_v22  ;;  %v2746_v27 = vadd.f32 %v3735_v26, %v4789_v60  ;;  %v2737_v28 = vpop.f32.mrb[171].mxu1 }
 0x58d   :  { %2857 = vst.msk [vmem:[%s5115_s4 + $0x160] sm:$0xff] %vm136_vm0, %v2735_v25  ;;  %v2738_v44 = vadd.f32 %v4789_v60, %v2737_v28 }
 0x58e   :  { %2860 = vst.msk [vmem:[%s5115_s4 + $0x178] sm:$0xff] %vm136_vm0, %v2746_v27 }
 0x58f   :  { %2858 = vst.msk [vmem:[%s5115_s4 + $0x168] sm:$0xff] %vm136_vm0, %v2738_v44 }
 0x591   :  { %v3738_v29 = vpop.f32.mrb[172].mxu1 }
 0x592   :  { %v2759_v30 = vadd.f32 %v3738_v29, %v4789_v60  ;;  %v2750_v31 = vpop.f32.mrb[173].mxu1 }
 0x593   :  { %v2751_v32 = vadd.f32 %v4789_v60, %v2750_v31  ;;  %v3739_v33 = vpop.f32.mrb[174].mxu1 }
 0x594   :  { %2863 = vst.msk [vmem:[%s5115_s4 + $0x190] sm:$0xff] %vm136_vm0, %v2759_v30  ;;  %v2762_v34 = vadd.f32 %v3739_v33, %v4789_v60  ;;  %v2753_v35 = vpop.f32.mrb[175].mxu1 }
 0x595   :  { %2861 = vst.msk [vmem:[%s5115_s4 + $0x180] sm:$0xff] %vm136_vm0, %v2751_v32  ;;  %v2754_v36 = vadd.f32 %v4789_v60, %v2753_v35 }
 0x596   :  { %2864 = vst.msk [vmem:[%s5115_s4 + $0x198] sm:$0xff] %vm136_vm0, %v2762_v34 }
 0x597   :  { %2862 = vst.msk [vmem:[%s5115_s4 + $0x188] sm:$0xff] %vm136_vm0, %v2754_v36 }
 0x599   :  { %v3742_v37 = vpop.f32.mrb[176].mxu1 }
 0x59a   :  { %v2775_v38 = vadd.f32 %v3742_v37, %v4789_v60  ;;  %v2766_v39 = vpop.f32.mrb[177].mxu1 }
 0x59b   :  { %v2767_v40 = vadd.f32 %v4789_v60, %v2766_v39  ;;  %v3743_v41 = vpop.f32.mrb[178].mxu1 }
 0x59c   :  { %2867 = vst.msk [vmem:[%s5115_s4 + $0x1b0] sm:$0xff] %vm136_vm0, %v2775_v38  ;;  %v2778_v42 = vadd.f32 %v3743_v41, %v4789_v60  ;;  %v2769_v43 = vpop.f32.mrb[179].mxu1 }
 0x59d   :  { %2865 = vst.msk [vmem:[%s5115_s4 + $0x1a0] sm:$0xff] %vm136_vm0, %v2767_v40  ;;  %v2770_v45 = vadd.f32 %v4789_v60, %v2769_v43 }
 0x59e   :  { %2868 = vst.msk [vmem:[%s5115_s4 + $0x1b8] sm:$0xff] %vm136_vm0, %v2778_v42 }
 0x59f   :  { %2866 = vst.msk [vmem:[%s5115_s4 + $0x1a8] sm:$0xff] %vm136_vm0, %v2770_v45 }
 0x5a1   :  { %v3746_v46 = vpop.f32.mrb[180].mxu1 }
 0x5a2   :  { %v2791_v47 = vadd.f32 %v3746_v46, %v4789_v60  ;;  %v2782_v48 = vpop.f32.mrb[181].mxu1 }
 0x5a3   :  { %v2783_v49 = vadd.f32 %v4789_v60, %v2782_v48  ;;  %v3747_v50 = vpop.f32.mrb[182].mxu1 }
 0x5a4   :  { %2871 = vst.msk [vmem:[%s5115_s4 + $0x1d0] sm:$0xff] %vm136_vm0, %v2791_v47  ;;  %v2794_v51 = vadd.f32 %v3747_v50, %v4789_v60  ;;  %v2785_v52 = vpop.f32.mrb[183].mxu1 }
 0x5a5   :  { %2869 = vst.msk [vmem:[%s5115_s4 + $0x1c0] sm:$0xff] %vm136_vm0, %v2783_v49  ;;  %v2786_v53 = vadd.f32 %v4789_v60, %v2785_v52 }
 0x5a6   :  { %2872 = vst.msk [vmem:[%s5115_s4 + $0x1d8] sm:$0xff] %vm136_vm0, %v2794_v51 }
 0x5a7   :  { %2870 = vst.msk [vmem:[%s5115_s4 + $0x1c8] sm:$0xff] %vm136_vm0, %v2786_v53 }
 0x5a9   :  { %v3750_v54 = vpop.f32.mrb[184].mxu1 }
 0x5aa   :  { %v2807_v55 = vadd.f32 %v3750_v54, %v4789_v60  ;;  %v2798_v56 = vpop.f32.mrb[185].mxu1 }
 0x5ab   :  { %v2799_v57 = vadd.f32 %v4789_v60, %v2798_v56  ;;  %v3751_v58 = vpop.f32.mrb[186].mxu1 }
 0x5ac   :  { %2875 = vst.msk [vmem:[%s5115_s4 + $0x1f0] sm:$0xff] %vm136_vm0, %v2807_v55  ;;  %v2810_v59 = vadd.f32 %v3751_v58, %v4789_v60  ;;  %v2801_v61 = vpop.f32.mrb[187].mxu1 }
 0x5ad   :  { %2873 = vst.msk [vmem:[%s5115_s4 + $0x1e0] sm:$0xff] %vm136_vm0, %v2799_v57  ;;  %v2802_v62 = vadd.f32 %v4789_v60, %v2801_v61 }
 0x5ae   :  { %2876 = vst.msk [vmem:[%s5115_s4 + $0x1f8] sm:$0xff] %vm136_vm0, %v2810_v59 }
 0x5af   :  { %2874 = vst.msk [vmem:[%s5115_s4 + $0x1e8] sm:$0xff] %vm136_vm0, %v2802_v62 }

</bundles_post_ra>
